<compile_context>
chip_gen: v6e
topology: v6e:2x2x1
jax: 0.10.0
libtpu: 0.0.40
codegen_flags: <defaults>
</compile_context>

<pallas_src>
import functools

import jax
import jax.numpy as jnp
import numpy as np
from jax.experimental import pallas as pl
from jax.experimental.pallas import tpu as pltpu


# ---------------------------------------------------------------------------
# helpers
# ---------------------------------------------------------------------------
def _round_up(x, m):
    return (x + m - 1) // m * m


# ---------------------------------------------------------------------------
# Kernel 1: tiled matmul + bias (+ReLU)   (used for the 1x1 conv1)
# ---------------------------------------------------------------------------
def _mm_bias_kernel(x_ref, w_ref, b_ref, o_ref, acc_ref, *, relu):
    k = pl.program_id(2)

    @pl.when(k == 0)
    def _init():
        acc_ref[...] = jnp.zeros_like(acc_ref)

    acc_ref[...] += jnp.dot(x_ref[...], w_ref[...],
                            preferred_element_type=jnp.float32)

    @pl.when(k == pl.num_programs(2) - 1)
    def _finalize():
        acc = acc_ref[...] + b_ref[...]
        if relu:
            acc = jnp.maximum(acc, 0.0)
        o_ref[...] = acc.astype(o_ref.dtype)


def matmul_bias(x, w, b, *, relu, out_dtype):
    """y = [ReLU](x @ w + b); x:(M,K), w:(K,Cout), b:(1,Cout). K, Cout are
    multiples of 128 (guaranteed by prepare_params); M is padded here."""
    M, K = x.shape
    Cout = w.shape[1]

    tm = 256 if M >= 256 else _round_up(M, 8)
    Mp = _round_up(M, tm)
    if Mp != M:
        x = jnp.pad(x, ((0, Mp - M), (0, 0)))
    tn = 256 if (Cout % 256 == 0 and Cout >= 256) else 128
    tk = next(t for t in (512, 256, 128) if K % t == 0)

    grid = (Mp // tm, Cout // tn, K // tk)
    y = pl.pallas_call(
        functools.partial(_mm_bias_kernel, relu=relu),
        out_shape=jax.ShapeDtypeStruct((Mp, Cout), out_dtype),
        grid_spec=pltpu.PrefetchScalarGridSpec(
            num_scalar_prefetch=0,
            grid=grid,
            in_specs=[
                pl.BlockSpec((tm, tk), lambda i, j, k: (i, k)),
                pl.BlockSpec((tk, tn), lambda i, j, k: (k, j)),
                pl.BlockSpec((1, tn), lambda i, j, k: (0, j)),
            ],
            out_specs=pl.BlockSpec((tm, tn), lambda i, j, k: (i, j)),
            scratch_shapes=[pltpu.VMEM((tm, tn), jnp.float32)],
        ),
        compiler_params=pltpu.CompilerParams(
            dimension_semantics=("parallel", "parallel", "arbitrary"),
            vmem_limit_bytes=32 * 1024 * 1024,
        ),
    )(x, w, b)
    return y[:M] if Mp != M else y


# ---------------------------------------------------------------------------
# Kernel 2: fused 3x3 conv (stride 1/2) + bias + ReLU  ->  1x1 conv + bias
#           (conv2 + conv3 in one kernel; mid activation never touches HBM)
# ---------------------------------------------------------------------------
def _conv3x3_conv1x1_kernel(x_ref, w2_ref, b2_ref, w3_ref, b3_ref, o_ref, *,
                            stride, th, mid_dtype):
    # x_ref  : (s, s, 1, Hq, Wq, Cm)   space-to-depth'd, padded input (1 batch)
    # w2_ref : (3, 3, Cm, Cm)          3x3 weights (channel-padded)
    # b2_ref : (1, Cm)
    # w3_ref : (Cm, Cop)               1x1 weights (channel-padded)
    # b3_ref : (1, Cop)
    # o_ref  : (1, th, Wo, Cop)
    s = stride
    _, _, Wo, Cop = o_ref.shape
    Cm = x_ref.shape[-1]
    io = pl.program_id(1)
    row0 = io * th

    acc = jnp.zeros((th * Wo, Cm), jnp.float32)
    for kh in range(3):
        ph, dh = kh % s, kh // s
        for kw in range(3):
            pw, dw = kw % s, kw // s
            # contiguous slice thanks to the space-to-depth rearrangement:
            # output (i, j) reads xps[ph, pw, n, i + dh, j + dw, :]
            lhs = x_ref[ph, pw, 0, pl.ds(row0 + dh, th), pl.ds(dw, Wo), :]
            lhs = lhs.reshape(th * Wo, Cm)
            acc += jnp.dot(lhs, w2_ref[kh, kw],
                           preferred_element_type=jnp.float32)

    # conv2 epilogue: bias + ReLU, cast to the compute dtype (MXU input)
    mid = jnp.maximum(acc + b2_ref[...], 0.0).astype(mid_dtype)
    # conv3 (1x1): matmul + bias, no activation
    out = jnp.dot(mid, w3_ref[...], preferred_element_type=jnp.float32)
    out = out + b3_ref[...]
    o_ref[...] = out.reshape(1, th, Wo, Cop).astype(o_ref.dtype)


def conv3x3_conv1x1_fused(x_nhwc, w2, b2, w3, b3, stride, *, mid_dtype):
    """Fused [3x3 conv, pad=1, stride s, bias, ReLU] -> [1x1 conv, bias].
    x:(N,H,W,Cm), w2:(3,3,Cm,Cm), w3:(Cm,Cop). Output is f32 (N,Ho,Wo,Cop)."""
    N, H, W, Cm = x_nhwc.shape
    Cop = w3.shape[-1]
    s = int(stride)
    Ho = (H + 2 - 3) // s + 1
    Wo = (W + 2 - 3) // s + 1

    # spatial pad (conv padding=1) + alignment pad up to s*Hq / s*Wq
    Hq = max(Ho - 1 + (2 // s) + 1, -(-(H + 2) // s))
    Wq = max(Wo - 1 + (2 // s) + 1, -(-(W + 2) // s))
    xp = jnp.pad(x_nhwc, ((0, 0),
                          (1, s * Hq - H - 1),
                          (1, s * Wq - W - 1),
                          (0, 0)))
    # space-to-depth by the stride: (s, s, N, Hq, Wq, Cm); all in-kernel tap
    # accesses become contiguous slices (no strided loads, no 9x im2col).
    xps = xp.reshape(N, Hq, s, Wq, s, Cm).transpose(2, 4, 0, 1, 3, 5)

    th = Ho if Ho <= 16 else next(d for d in (16, 8, 4, 2, 1) if Ho % d == 0)
    grid = (N, Ho // th)

    return pl.pallas_call(
        functools.partial(_conv3x3_conv1x1_kernel, stride=s, th=th,
                          mid_dtype=mid_dtype),
        out_shape=jax.ShapeDtypeStruct((N, Ho, Wo, Cop), jnp.float32),
        grid_spec=pltpu.PrefetchScalarGridSpec(
            num_scalar_prefetch=0,
            grid=grid,
            in_specs=[
                pl.BlockSpec((s, s, 1, Hq, Wq, Cm),
                             lambda n, io: (0, 0, n, 0, 0, 0)),
                pl.BlockSpec((3, 3, Cm, Cm), lambda n, io: (0, 0, 0, 0)),
                pl.BlockSpec((1, Cm), lambda n, io: (0, 0)),
                pl.BlockSpec((Cm, Cop), lambda n, io: (0, 0)),
                pl.BlockSpec((1, Cop), lambda n, io: (0, 0)),
            ],
            out_specs=pl.BlockSpec((1, th, Wo, Cop),
                                   lambda n, io: (n, io, 0, 0)),
        ),
        compiler_params=pltpu.CompilerParams(
            dimension_semantics=("parallel", "parallel"),
            vmem_limit_bytes=32 * 1024 * 1024,
        ),
    )(xps, w2, b2, w3, b3)


# ---------------------------------------------------------------------------
# Parameter preparation (done ONCE): transpose / pack / channel-pad weights
# ---------------------------------------------------------------------------
def prepare_params(p, compute_dtype=jnp.float32):
    mid_c, in_c = p["conv1_w"].shape[0], p["conv1_w"].shape[1]
    out_c = p["conv3_w"].shape[0]
    Kp = _round_up(in_c, 128)
    Cmp = _round_up(mid_c, 128)
    Cop = _round_up(out_c, 128)

    w1 = jnp.zeros((Kp, Cmp), compute_dtype).at[:in_c, :mid_c].set(
        p["conv1_w"].reshape(mid_c, in_c).T.astype(compute_dtype))
    b1 = jnp.zeros((1, Cmp), jnp.float32).at[:, :mid_c].set(p["conv1_b"][None])

    w2 = jnp.zeros((3, 3, Cmp, Cmp), compute_dtype).at[:, :, :mid_c, :mid_c].set(
        jnp.transpose(p["conv2_w"], (2, 3, 1, 0)).astype(compute_dtype))
    b2 = jnp.zeros((1, Cmp), jnp.float32).at[:, :mid_c].set(p["conv2_b"][None])

    w3 = jnp.zeros((Cmp, Cop), compute_dtype).at[:mid_c, :out_c].set(
        p["conv3_w"].reshape(out_c, mid_c).T.astype(compute_dtype))
    b3 = jnp.zeros((1, Cop), jnp.float32).at[:, :out_c].set(p["conv3_b"][None])

    return dict(w1=w1, b1=b1, w2=w2, b2=b2, w3=w3, b3=b3)


# ---------------------------------------------------------------------------
# Full WRNBottleneck forward (NCHW in/out, PyTorch semantics)
# ---------------------------------------------------------------------------
@functools.partial(jax.jit, static_argnames=("stride", "out_c", "compute_dtype"))
def wrn_bottleneck_forward(x_nchw, w1, b1, w2, b2, w3, b3, *,
                           stride, out_c, compute_dtype):
    x = jnp.transpose(x_nchw, (0, 2, 3, 1))          # NHWC
    N, H, W, Cin = x.shape
    Kp = w1.shape[0]
    if Kp > Cin:
        x = jnp.pad(x, ((0, 0), (0, 0), (0, 0), (0, Kp - Cin)))
    Cmp = w1.shape[1]

    # conv1: 1x1, stride 1, bias + ReLU
    xm = x.reshape(N * H * W, Kp).astype(compute_dtype)
    h = matmul_bias(xm, w1, b1, relu=True, out_dtype=compute_dtype)
    h = h.reshape(N, H, W, Cmp)

    # conv2 (3x3, stride s, pad 1, bias, ReLU) + conv3 (1x1, bias) fused;
    # the mid activation never round-trips through HBM.
    y = conv3x3_conv1x1_fused(h, w2, b2, w3, b3, stride,
                              mid_dtype=compute_dtype)
    y = y[..., :out_c]
    return jnp.transpose(y, (0, 3, 1, 2))            # NCHW


# ---------------------------------------------------------------------------
# Pure-JAX reference (mirrors the PyTorch WRNBottleneck exactly)
# ---------------------------------------------------------------------------
def _conv_ref(x, w, b, stride, pad):
    y = jax.lax.conv_general_dilated(
        x, w, window_strides=(stride, stride),
        padding=[(pad, pad), (pad, pad)],
        dimension_numbers=("NCHW", "OIHW", "NCHW"))
    return y + b[None, :, None, None]


def wrn_bottleneck_ref(x, p, stride):
    h = jax.nn.relu(_conv_ref(x, p["conv1_w"], p["conv1_b"], 1, 0))
    h = jax.nn.relu(_conv_ref(h, p["conv2_w"], p["conv2_b"], stride, 1))
    return _conv_ref(h, p["conv3_w"], p["conv3_b"], 1, 0)


# ---------------------------------------------------------------------------
def make_params(key, in_channels, out_channels, width_factor):
    mid_channels = int(round(out_channels // 4 * width_factor))
    ks = jax.random.split(key, 6)
    f32 = jnp.float32
    return {
        "conv1_w": jax.random.normal(ks[0], (mid_channels, in_channels, 1, 1), f32) * 0.1,
        "conv1_b": jax.random.normal(ks[1], (mid_channels,), f32) * 0.1,
        "conv2_w": jax.random.normal(ks[2], (mid_channels, mid_channels, 3, 3), f32) * 0.1,
        "conv2_b": jax.random.normal(ks[3], (mid_channels,), f32) * 0.1,
        "conv3_w": jax.random.normal(ks[4], (out_channels, mid_channels, 1, 1), f32) * 0.1,
        "conv3_b": jax.random.normal(ks[5], (out_channels,), f32) * 0.1,
    }


if __name__ == "__main__":
    key = jax.random.PRNGKey(0)
    k_x, k_p = jax.random.split(key)

    # WRNBottleneck(in_channels=32, out_channels=64, stride=s, width_factor=2.0)
    in_channels, out_channels, width_factor = 32, 64, 2.0
    N, H, W = 2, 8, 8

    x = jax.random.normal(k_x, (N, in_channels, H, W), jnp.float32)
    params = make_params(k_p, in_channels, out_channels, width_factor)

    pp_f32 = prepare_params(params, jnp.float32)
    pp_bf16 = prepare_params(params, jnp.bfloat16)

    for stride in (1, 2):
        ref = jax.block_until_ready(wrn_bottleneck_ref(x, params, stride))

        # fp32 compute path: tight check
        out = wrn_bottleneck_forward(
            x, pp_f32["w1"], pp_f32["b1"], pp_f32["w2"], pp_f32["b2"],
            pp_f32["w3"], pp_f32["b3"],
            stride=stride, out_c=out_channels, compute_dtype=jnp.float32)
        out = jax.block_until_ready(out)
        assert out.shape == ref.shape, (out.shape, ref.shape)
        np.testing.assert_allclose(np.asarray(out), np.asarray(ref),
                                   rtol=1e-4, atol=1e-4)

        # bf16 compute path (v6e/v7x MXU-friendly): loose check
        outb = wrn_bottleneck_forward(
            x, pp_bf16["w1"], pp_bf16["b1"], pp_bf16["w2"], pp_bf16["b2"],
            pp_bf16["w3"], pp_bf16["b3"],
            stride=stride, out_c=out_channels, compute_dtype=jnp.bfloat16)
        outb = jax.block_until_ready(outb)
        np.testing.assert_allclose(np.asarray(outb), np.asarray(ref),
                                   rtol=5e-2, atol=5e-2)

    print("KERNEL_OK")
</pallas_src>

<mosaic_0001>
module attributes {stable_mosaic.version = 11 : i64} {
  func.func @_conv3x3_conv1x1_kernel(%arg0: i32, %arg1: i32, %arg2: memref<1x1x1x10x10x128xf32, #tpu.memory_space<vmem>>, %arg3: memref<3x3x128x128xf32, #tpu.memory_space<vmem>>, %arg4: memref<1x128xf32, #tpu.memory_space<vmem>>, %arg5: memref<128x128xf32, #tpu.memory_space<vmem>>, %arg6: memref<1x128xf32, #tpu.memory_space<vmem>>, %arg7: memref<1x8x8x128xf32, #tpu.memory_space<vmem>>) attributes {dimension_semantics = [#tpu.dimension_semantics<parallel>, #tpu.dimension_semantics<parallel>], iteration_bounds = array<i64: 2, 1>, scalar_prefetch = 0 : i64, scratch_operands = 0 : i64, tpu.core_type = #tpu.core_type<tc>, window_params = [{transform_indices = @transform_0, window_bounds = array<i64: 1, 1, 1, 10, 10, 128>}, {pipeline_mode = #tpu.pipeline_mode<synchronous>, transform_indices = @transform_1, window_bounds = array<i64: 3, 3, 128, 128>}, {pipeline_mode = #tpu.pipeline_mode<synchronous>, transform_indices = @transform_2, window_bounds = array<i64: 1, 128>}, {pipeline_mode = #tpu.pipeline_mode<synchronous>, transform_indices = @transform_3, window_bounds = array<i64: 128, 128>}, {pipeline_mode = #tpu.pipeline_mode<synchronous>, transform_indices = @transform_4, window_bounds = array<i64: 1, 128>}, {transform_indices = @transform_5, window_bounds = array<i64: 1, 8, 8, 128>}]} {
    %c8_i32 = arith.constant 8 : i32
    %0 = arith.muli %arg1, %c8_i32 : i32
    %cst = arith.constant 0.000000e+00 : f32
    %1 = vector.broadcast %cst : f32 to vector<64x128xf32>
    %c0_i32 = arith.constant 0 : i32
    %2 = arith.addi %0, %c0_i32 : i32
    %c0 = arith.constant 0 : index
    %c0_0 = arith.constant 0 : index
    %c0_1 = arith.constant 0 : index
    %3 = arith.index_cast %2 : i32 to index
    %c0_2 = arith.constant 0 : index
    %c0_3 = arith.constant 0 : index
    %4 = vector.load %arg2[%c0, %c0_0, %c0_1, %3, %c0_2, %c0_3] : memref<1x1x1x10x10x128xf32, #tpu.memory_space<vmem>>, vector<1x1x1x8x8x128xf32>
    %5 = vector.shape_cast %4 : vector<1x1x1x8x8x128xf32> to vector<8x8x128xf32>
    %6 = vector.shape_cast %5 : vector<8x8x128xf32> to vector<64x128xf32>
    %c0_4 = arith.constant 0 : index
    %c0_5 = arith.constant 0 : index
    %c0_6 = arith.constant 0 : index
    %c0_7 = arith.constant 0 : index
    %7 = vector.load %arg3[%c0_4, %c0_5, %c0_6, %c0_7] : memref<3x3x128x128xf32, #tpu.memory_space<vmem>>, vector<1x1x128x128xf32>
    %8 = vector.shape_cast %7 : vector<1x1x128x128xf32> to vector<128x128xf32>
    %cst_8 = arith.constant dense<0.000000e+00> : vector<64x128xf32>
    %9 = tpu.matmul %6, %8, %cst_8 {dimension_numbers = #tpu.dot_dimension_numbers<[1], [0], [0], [1], [0, 0, 1, 1], [], []>} : vector<64x128xf32>, vector<128x128xf32>, vector<64x128xf32> -> vector<64x128xf32>
    %10 = arith.addf %1, %9 : vector<64x128xf32>
    %c0_i32_9 = arith.constant 0 : i32
    %11 = arith.addi %0, %c0_i32_9 : i32
    %c0_10 = arith.constant 0 : index
    %c0_11 = arith.constant 0 : index
    %c0_12 = arith.constant 0 : index
    %12 = arith.index_cast %11 : i32 to index
    %c1 = arith.constant 1 : index
    %c0_13 = arith.constant 0 : index
    %13 = vector.load %arg2[%c0_10, %c0_11, %c0_12, %12, %c1, %c0_13] : memref<1x1x1x10x10x128xf32, #tpu.memory_space<vmem>>, vector<1x1x1x8x8x128xf32>
    %14 = vector.shape_cast %13 : vector<1x1x1x8x8x128xf32> to vector<8x8x128xf32>
    %15 = vector.shape_cast %14 : vector<8x8x128xf32> to vector<64x128xf32>
    %c0_14 = arith.constant 0 : index
    %c1_15 = arith.constant 1 : index
    %c0_16 = arith.constant 0 : index
    %c0_17 = arith.constant 0 : index
    %16 = vector.load %arg3[%c0_14, %c1_15, %c0_16, %c0_17] : memref<3x3x128x128xf32, #tpu.memory_space<vmem>>, vector<1x1x128x128xf32>
    %17 = vector.shape_cast %16 : vector<1x1x128x128xf32> to vector<128x128xf32>
    %cst_18 = arith.constant dense<0.000000e+00> : vector<64x128xf32>
    %18 = tpu.matmul %15, %17, %cst_18 {dimension_numbers = #tpu.dot_dimension_numbers<[1], [0], [0], [1], [0, 0, 1, 1], [], []>} : vector<64x128xf32>, vector<128x128xf32>, vector<64x128xf32> -> vector<64x128xf32>
    %19 = arith.addf %10, %18 : vector<64x128xf32>
    %c0_i32_19 = arith.constant 0 : i32
    %20 = arith.addi %0, %c0_i32_19 : i32
    %c0_20 = arith.constant 0 : index
    %c0_21 = arith.constant 0 : index
    %c0_22 = arith.constant 0 : index
    %21 = arith.index_cast %20 : i32 to index
    %c2 = arith.constant 2 : index
    %c0_23 = arith.constant 0 : index
    %22 = vector.load %arg2[%c0_20, %c0_21, %c0_22, %21, %c2, %c0_23] : memref<1x1x1x10x10x128xf32, #tpu.memory_space<vmem>>, vector<1x1x1x8x8x128xf32>
    %23 = vector.shape_cast %22 : vector<1x1x1x8x8x128xf32> to vector<8x8x128xf32>
    %24 = vector.shape_cast %23 : vector<8x8x128xf32> to vector<64x128xf32>
    %c0_24 = arith.constant 0 : index
    %c2_25 = arith.constant 2 : index
    %c0_26 = arith.constant 0 : index
    %c0_27 = arith.constant 0 : index
    %25 = vector.load %arg3[%c0_24, %c2_25, %c0_26, %c0_27] : memref<3x3x128x128xf32, #tpu.memory_space<vmem>>, vector<1x1x128x128xf32>
    %26 = vector.shape_cast %25 : vector<1x1x128x128xf32> to vector<128x128xf32>
    %cst_28 = arith.constant dense<0.000000e+00> : vector<64x128xf32>
    %27 = tpu.matmul %24, %26, %cst_28 {dimension_numbers = #tpu.dot_dimension_numbers<[1], [0], [0], [1], [0, 0, 1, 1], [], []>} : vector<64x128xf32>, vector<128x128xf32>, vector<64x128xf32> -> vector<64x128xf32>
    %28 = arith.addf %19, %27 : vector<64x128xf32>
    %c1_i32 = arith.constant 1 : i32
    %29 = arith.addi %0, %c1_i32 : i32
    %c0_29 = arith.constant 0 : index
    %c0_30 = arith.constant 0 : index
    %c0_31 = arith.constant 0 : index
    %30 = arith.index_cast %29 : i32 to index
    %c0_32 = arith.constant 0 : index
    %c0_33 = arith.constant 0 : index
    %31 = vector.load %arg2[%c0_29, %c0_30, %c0_31, %30, %c0_32, %c0_33] : memref<1x1x1x10x10x128xf32, #tpu.memory_space<vmem>>, vector<1x1x1x8x8x128xf32>
    %32 = vector.shape_cast %31 : vector<1x1x1x8x8x128xf32> to vector<8x8x128xf32>
    %33 = vector.shape_cast %32 : vector<8x8x128xf32> to vector<64x128xf32>
    %c1_34 = arith.constant 1 : index
    %c0_35 = arith.constant 0 : index
    %c0_36 = arith.constant 0 : index
    %c0_37 = arith.constant 0 : index
    %34 = vector.load %arg3[%c1_34, %c0_35, %c0_36, %c0_37] : memref<3x3x128x128xf32, #tpu.memory_space<vmem>>, vector<1x1x128x128xf32>
    %35 = vector.shape_cast %34 : vector<1x1x128x128xf32> to vector<128x128xf32>
    %cst_38 = arith.constant dense<0.000000e+00> : vector<64x128xf32>
    %36 = tpu.matmul %33, %35, %cst_38 {dimension_numbers = #tpu.dot_dimension_numbers<[1], [0], [0], [1], [0, 0, 1, 1], [], []>} : vector<64x128xf32>, vector<128x128xf32>, vector<64x128xf32> -> vector<64x128xf32>
    %37 = arith.addf %28, %36 : vector<64x128xf32>
    %c1_i32_39 = arith.constant 1 : i32
    %38 = arith.addi %0, %c1_i32_39 : i32
    %c0_40 = arith.constant 0 : index
    %c0_41 = arith.constant 0 : index
    %c0_42 = arith.constant 0 : index
    %39 = arith.index_cast %38 : i32 to index
    %c1_43 = arith.constant 1 : index
    %c0_44 = arith.constant 0 : index
    %40 = vector.load %arg2[%c0_40, %c0_41, %c0_42, %39, %c1_43, %c0_44] : memref<1x1x1x10x10x128xf32, #tpu.memory_space<vmem>>, vector<1x1x1x8x8x128xf32>
    %41 = vector.shape_cast %40 : vector<1x1x1x8x8x128xf32> to vector<8x8x128xf32>
    %42 = vector.shape_cast %41 : vector<8x8x128xf32> to vector<64x128xf32>
    %c1_45 = arith.constant 1 : index
    %c1_46 = arith.constant 1 : index
    %c0_47 = arith.constant 0 : index
    %c0_48 = arith.constant 0 : index
    %43 = vector.load %arg3[%c1_45, %c1_46, %c0_47, %c0_48] : memref<3x3x128x128xf32, #tpu.memory_space<vmem>>, vector<1x1x128x128xf32>
    %44 = vector.shape_cast %43 : vector<1x1x128x128xf32> to vector<128x128xf32>
    %cst_49 = arith.constant dense<0.000000e+00> : vector<64x128xf32>
    %45 = tpu.matmul %42, %44, %cst_49 {dimension_numbers = #tpu.dot_dimension_numbers<[1], [0], [0], [1], [0, 0, 1, 1], [], []>} : vector<64x128xf32>, vector<128x128xf32>, vector<64x128xf32> -> vector<64x128xf32>
    %46 = arith.addf %37, %45 : vector<64x128xf32>
    %c1_i32_50 = arith.constant 1 : i32
    %47 = arith.addi %0, %c1_i32_50 : i32
    %c0_51 = arith.constant 0 : index
    %c0_52 = arith.constant 0 : index
    %c0_53 = arith.constant 0 : index
    %48 = arith.index_cast %47 : i32 to index
    %c2_54 = arith.constant 2 : index
    %c0_55 = arith.constant 0 : index
    %49 = vector.load %arg2[%c0_51, %c0_52, %c0_53, %48, %c2_54, %c0_55] : memref<1x1x1x10x10x128xf32, #tpu.memory_space<vmem>>, vector<1x1x1x8x8x128xf32>
    %50 = vector.shape_cast %49 : vector<1x1x1x8x8x128xf32> to vector<8x8x128xf32>
    %51 = vector.shape_cast %50 : vector<8x8x128xf32> to vector<64x128xf32>
    %c1_56 = arith.constant 1 : index
    %c2_57 = arith.constant 2 : index
    %c0_58 = arith.constant 0 : index
    %c0_59 = arith.constant 0 : index
    %52 = vector.load %arg3[%c1_56, %c2_57, %c0_58, %c0_59] : memref<3x3x128x128xf32, #tpu.memory_space<vmem>>, vector<1x1x128x128xf32>
    %53 = vector.shape_cast %52 : vector<1x1x128x128xf32> to vector<128x128xf32>
    %cst_60 = arith.constant dense<0.000000e+00> : vector<64x128xf32>
    %54 = tpu.matmul %51, %53, %cst_60 {dimension_numbers = #tpu.dot_dimension_numbers<[1], [0], [0], [1], [0, 0, 1, 1], [], []>} : vector<64x128xf32>, vector<128x128xf32>, vector<64x128xf32> -> vector<64x128xf32>
    %55 = arith.addf %46, %54 : vector<64x128xf32>
    %c2_i32 = arith.constant 2 : i32
    %56 = arith.addi %0, %c2_i32 : i32
    %c0_61 = arith.constant 0 : index
    %c0_62 = arith.constant 0 : index
    %c0_63 = arith.constant 0 : index
    %57 = arith.index_cast %56 : i32 to index
    %c0_64 = arith.constant 0 : index
    %c0_65 = arith.constant 0 : index
    %58 = vector.load %arg2[%c0_61, %c0_62, %c0_63, %57, %c0_64, %c0_65] : memref<1x1x1x10x10x128xf32, #tpu.memory_space<vmem>>, vector<1x1x1x8x8x128xf32>
    %59 = vector.shape_cast %58 : vector<1x1x1x8x8x128xf32> to vector<8x8x128xf32>
    %60 = vector.shape_cast %59 : vector<8x8x128xf32> to vector<64x128xf32>
    %c2_66 = arith.constant 2 : index
    %c0_67 = arith.constant 0 : index
    %c0_68 = arith.constant 0 : index
    %c0_69 = arith.constant 0 : index
    %61 = vector.load %arg3[%c2_66, %c0_67, %c0_68, %c0_69] : memref<3x3x128x128xf32, #tpu.memory_space<vmem>>, vector<1x1x128x128xf32>
    %62 = vector.shape_cast %61 : vector<1x1x128x128xf32> to vector<128x128xf32>
    %cst_70 = arith.constant dense<0.000000e+00> : vector<64x128xf32>
    %63 = tpu.matmul %60, %62, %cst_70 {dimension_numbers = #tpu.dot_dimension_numbers<[1], [0], [0], [1], [0, 0, 1, 1], [], []>} : vector<64x128xf32>, vector<128x128xf32>, vector<64x128xf32> -> vector<64x128xf32>
    %64 = arith.addf %55, %63 : vector<64x128xf32>
    %c2_i32_71 = arith.constant 2 : i32
    %65 = arith.addi %0, %c2_i32_71 : i32
    %c0_72 = arith.constant 0 : index
    %c0_73 = arith.constant 0 : index
    %c0_74 = arith.constant 0 : index
    %66 = arith.index_cast %65 : i32 to index
    %c1_75 = arith.constant 1 : index
    %c0_76 = arith.constant 0 : index
    %67 = vector.load %arg2[%c0_72, %c0_73, %c0_74, %66, %c1_75, %c0_76] : memref<1x1x1x10x10x128xf32, #tpu.memory_space<vmem>>, vector<1x1x1x8x8x128xf32>
    %68 = vector.shape_cast %67 : vector<1x1x1x8x8x128xf32> to vector<8x8x128xf32>
    %69 = vector.shape_cast %68 : vector<8x8x128xf32> to vector<64x128xf32>
    %c2_77 = arith.constant 2 : index
    %c1_78 = arith.constant 1 : index
    %c0_79 = arith.constant 0 : index
    %c0_80 = arith.constant 0 : index
    %70 = vector.load %arg3[%c2_77, %c1_78, %c0_79, %c0_80] : memref<3x3x128x128xf32, #tpu.memory_space<vmem>>, vector<1x1x128x128xf32>
    %71 = vector.shape_cast %70 : vector<1x1x128x128xf32> to vector<128x128xf32>
    %cst_81 = arith.constant dense<0.000000e+00> : vector<64x128xf32>
    %72 = tpu.matmul %69, %71, %cst_81 {dimension_numbers = #tpu.dot_dimension_numbers<[1], [0], [0], [1], [0, 0, 1, 1], [], []>} : vector<64x128xf32>, vector<128x128xf32>, vector<64x128xf32> -> vector<64x128xf32>
    %73 = arith.addf %64, %72 : vector<64x128xf32>
    %c2_i32_82 = arith.constant 2 : i32
    %74 = arith.addi %0, %c2_i32_82 : i32
    %c0_83 = arith.constant 0 : index
    %c0_84 = arith.constant 0 : index
    %c0_85 = arith.constant 0 : index
    %75 = arith.index_cast %74 : i32 to index
    %c2_86 = arith.constant 2 : index
    %c0_87 = arith.constant 0 : index
    %76 = vector.load %arg2[%c0_83, %c0_84, %c0_85, %75, %c2_86, %c0_87] : memref<1x1x1x10x10x128xf32, #tpu.memory_space<vmem>>, vector<1x1x1x8x8x128xf32>
    %77 = vector.shape_cast %76 : vector<1x1x1x8x8x128xf32> to vector<8x8x128xf32>
    %78 = vector.shape_cast %77 : vector<8x8x128xf32> to vector<64x128xf32>
    %c2_88 = arith.constant 2 : index
    %c2_89 = arith.constant 2 : index
    %c0_90 = arith.constant 0 : index
    %c0_91 = arith.constant 0 : index
    %79 = vector.load %arg3[%c2_88, %c2_89, %c0_90, %c0_91] : memref<3x3x128x128xf32, #tpu.memory_space<vmem>>, vector<1x1x128x128xf32>
    %80 = vector.shape_cast %79 : vector<1x1x128x128xf32> to vector<128x128xf32>
    %cst_92 = arith.constant dense<0.000000e+00> : vector<64x128xf32>
    %81 = tpu.matmul %78, %80, %cst_92 {dimension_numbers = #tpu.dot_dimension_numbers<[1], [0], [0], [1], [0, 0, 1, 1], [], []>} : vector<64x128xf32>, vector<128x128xf32>, vector<64x128xf32> -> vector<64x128xf32>
    %82 = arith.addf %73, %81 : vector<64x128xf32>
    %c0_93 = arith.constant 0 : index
    %c0_94 = arith.constant 0 : index
    %83 = vector.load %arg4[%c0_93, %c0_94] : memref<1x128xf32, #tpu.memory_space<vmem>>, vector<1x128xf32>
    %84 = vector.broadcast %83 : vector<1x128xf32> to vector<64x128xf32>
    %85 = arith.addf %82, %84 : vector<64x128xf32>
    %cst_95 = arith.constant 0.000000e+00 : f32
    %86 = vector.broadcast %cst_95 : f32 to vector<64x128xf32>
    %87 = arith.maximumf %85, %86 : vector<64x128xf32>
    %c0_96 = arith.constant 0 : index
    %c0_97 = arith.constant 0 : index
    %88 = vector.load %arg5[%c0_96, %c0_97] : memref<128x128xf32, #tpu.memory_space<vmem>>, vector<128x128xf32>
    %cst_98 = arith.constant dense<0.000000e+00> : vector<64x128xf32>
    %89 = tpu.matmul %87, %88, %cst_98 {dimension_numbers = #tpu.dot_dimension_numbers<[1], [0], [0], [1], [0, 0, 1, 1], [], []>} : vector<64x128xf32>, vector<128x128xf32>, vector<64x128xf32> -> vector<64x128xf32>
    %c0_99 = arith.constant 0 : index
    %c0_100 = arith.constant 0 : index
    %90 = vector.load %arg6[%c0_99, %c0_100] : memref<1x128xf32, #tpu.memory_space<vmem>>, vector<1x128xf32>
    %91 = vector.broadcast %90 : vector<1x128xf32> to vector<64x128xf32>
    %92 = arith.addf %89, %91 : vector<64x128xf32>
    %93 = vector.shape_cast %92 : vector<64x128xf32> to vector<1x8x8x128xf32>
    %c0_101 = arith.constant 0 : index
    %c0_102 = arith.constant 0 : index
    %c0_103 = arith.constant 0 : index
    %c0_104 = arith.constant 0 : index
    %94 = vector.load %arg7[%c0_101, %c0_102, %c0_103, %c0_104] : memref<1x8x8x128xf32, #tpu.memory_space<vmem>>, vector<1x8x8x128xf32>
    tpu.vector_store %arg7[%c0_101, %c0_102, %c0_103, %c0_104], %93 {strides = array<i32>} : memref<1x8x8x128xf32, #tpu.memory_space<vmem>>, vector<1x8x8x128xf32>,
    return
  }
  func.func @transform_0(%arg0: i32, %arg1: i32) -> (i32, i32, i32, i32, i32, i32) {
    %c0_i32 = arith.constant 0 : i32
    %c0_i32_0 = arith.constant 0 : i32
    %c0_i32_1 = arith.constant 0 : i32
    %c0_i32_2 = arith.constant 0 : i32
    %c0_i32_3 = arith.constant 0 : i32
    %c0_i32_4 = arith.constant 0 : i32
    return %c0_i32, %c0_i32_0, %arg0, %c0_i32_1, %c0_i32_2, %c0_i32_3 : i32, i32, i32, i32, i32, i32
  }
  func.func @transform_1(%arg0: i32, %arg1: i32) -> (i32, i32, i32, i32) {
    %c0_i32 = arith.constant 0 : i32
    %c0_i32_0 = arith.constant 0 : i32
    %c0_i32_1 = arith.constant 0 : i32
    %c0_i32_2 = arith.constant 0 : i32
    %c0_i32_3 = arith.constant 0 : i32
    return %c0_i32, %c0_i32_0, %c0_i32_1, %c0_i32_2 : i32, i32, i32, i32
  }
  func.func @transform_2(%arg0: i32, %arg1: i32) -> (i32, i32) {
    %c0_i32 = arith.constant 0 : i32
    %c0_i32_0 = arith.constant 0 : i32
    %c0_i32_1 = arith.constant 0 : i32
    return %c0_i32, %c0_i32_0 : i32, i32
  }
  func.func @transform_3(%arg0: i32, %arg1: i32) -> (i32, i32) {
    %c0_i32 = arith.constant 0 : i32
    %c0_i32_0 = arith.constant 0 : i32
    %c0_i32_1 = arith.constant 0 : i32
    return %c0_i32, %c0_i32_0 : i32, i32
  }
  func.func @transform_4(%arg0: i32, %arg1: i32) -> (i32, i32) {
    %c0_i32 = arith.constant 0 : i32
    %c0_i32_0 = arith.constant 0 : i32
    %c0_i32_1 = arith.constant 0 : i32
    return %c0_i32, %c0_i32_0 : i32, i32
  }
  func.func @transform_5(%arg0: i32, %arg1: i32) -> (i32, i32, i32, i32) {
    %c0_i32 = arith.constant 0 : i32
    %c0_i32_0 = arith.constant 0 : i32
    %c0_i32_1 = arith.constant 0 : i32
    return %arg0, %arg1, %c0_i32, %c0_i32_0 : i32, i32, i32, i32
  }
}

module attributes {stable_mosaic.version = 11 : i64} {
  func.func @_mm_bias_kernel(%arg0: i32, %arg1: i32, %arg2: i32, %arg3: memref<128x128xf32, #tpu.memory_space<vmem>>, %arg4: memref<128x128xf32, #tpu.memory_space<vmem>>, %arg5: memref<1x128xf32, #tpu.memory_space<vmem>>, %arg6: memref<128x128xf32, #tpu.memory_space<vmem>>, %arg7: memref<128x128xf32, #tpu.memory_space<vmem>>) attributes {dimension_semantics = [#tpu.dimension_semantics<parallel>, #tpu.dimension_semantics<parallel>, #tpu.dimension_semantics<arbitrary>], iteration_bounds = array<i64: 1, 1, 1>, scalar_prefetch = 0 : i64, scratch_operands = 1 : i64, tpu.core_type = #tpu.core_type<tc>, window_params = [{transform_indices = @transform_0, window_bounds = array<i64: 128, 128>}, {transform_indices = @transform_1, window_bounds = array<i64: 128, 128>}, {transform_indices = @transform_2, window_bounds = array<i64: 1, 128>}, {transform_indices = @transform_3, window_bounds = array<i64: 128, 128>}]} {
    %c0_i32 = arith.constant 0 : i32
    %0 = arith.cmpi eq, %arg2, %c0_i32 : i32
    %1 = arith.extui %0 : i1 to i32
    %c0_i32_0 = arith.constant 0 : i32
    %2 = arith.cmpi ne, %1, %c0_i32_0 : i32
    scf.if %2 {
      %cst_10 = arith.constant 0.000000e+00 : f32
      %12 = vector.broadcast %cst_10 : f32 to vector<128x128xf32>
      %c0_11 = arith.constant 0 : index
      %c0_12 = arith.constant 0 : index
      %13 = vector.load %arg7[%c0_11, %c0_12] : memref<128x128xf32, #tpu.memory_space<vmem>>, vector<128x128xf32>
      tpu.vector_store %arg7[%c0_11, %c0_12], %12 {strides = array<i32>} : memref<128x128xf32, #tpu.memory_space<vmem>>, vector<128x128xf32>,
    } else {
    }
    %c0 = arith.constant 0 : index
    %c0_1 = arith.constant 0 : index
    %3 = vector.load %arg7[%c0, %c0_1] : memref<128x128xf32, #tpu.memory_space<vmem>>, vector<128x128xf32>
    %c0_2 = arith.constant 0 : index
    %c0_3 = arith.constant 0 : index
    %4 = vector.load %arg3[%c0_2, %c0_3] : memref<128x128xf32, #tpu.memory_space<vmem>>, vector<128x128xf32>
    %c0_4 = arith.constant 0 : index
    %c0_5 = arith.constant 0 : index
    %5 = vector.load %arg4[%c0_4, %c0_5] : memref<128x128xf32, #tpu.memory_space<vmem>>, vector<128x128xf32>
    %cst = arith.constant dense<0.000000e+00> : vector<128x128xf32>
    %6 = tpu.matmul %4, %5, %cst {dimension_numbers = #tpu.dot_dimension_numbers<[1], [0], [0], [1], [0, 0, 1, 1], [], []>} : vector<128x128xf32>, vector<128x128xf32>, vector<128x128xf32> -> vector<128x128xf32>
    %7 = arith.addf %3, %6 : vector<128x128xf32>
    %c0_6 = arith.constant 0 : index
    %c0_7 = arith.constant 0 : index
    %8 = vector.load %arg7[%c0_6, %c0_7] : memref<128x128xf32, #tpu.memory_space<vmem>>, vector<128x128xf32>
    tpu.vector_store %arg7[%c0_6, %c0_7], %7 {strides = array<i32>} : memref<128x128xf32, #tpu.memory_space<vmem>>, vector<128x128xf32>,
    %c0_i32_8 = arith.constant 0 : i32
    %9 = arith.cmpi eq, %arg2, %c0_i32_8 : i32
    %10 = arith.extui %9 : i1 to i32
    %c0_i32_9 = arith.constant 0 : i32
    %11 = arith.cmpi ne, %10, %c0_i32_9 : i32
    scf.if %11 {
      %c0_10 = arith.constant 0 : index
      %c0_11 = arith.constant 0 : index
      %12 = vector.load %arg7[%c0_10, %c0_11] : memref<128x128xf32, #tpu.memory_space<vmem>>, vector<128x128xf32>
      %c0_12 = arith.constant 0 : index
      %c0_13 = arith.constant 0 : index
      %13 = vector.load %arg5[%c0_12, %c0_13] : memref<1x128xf32, #tpu.memory_space<vmem>>, vector<1x128xf32>
      %14 = vector.broadcast %13 : vector<1x128xf32> to vector<128x128xf32>
      %15 = arith.addf %12, %14 : vector<128x128xf32>
      %cst_14 = arith.constant 0.000000e+00 : f32
      %16 = vector.broadcast %cst_14 : f32 to vector<128x128xf32>
      %17 = arith.maximumf %15, %16 : vector<128x128xf32>
      %c0_15 = arith.constant 0 : index
      %c0_16 = arith.constant 0 : index
      %18 = vector.load %arg6[%c0_15, %c0_16] : memref<128x128xf32, #tpu.memory_space<vmem>>, vector<128x128xf32>
      tpu.vector_store %arg6[%c0_15, %c0_16], %17 {strides = array<i32>} : memref<128x128xf32, #tpu.memory_space<vmem>>, vector<128x128xf32>,
    } else {
    }
    return
  }
  func.func @transform_0(%arg0: i32, %arg1: i32, %arg2: i32) -> (i32, i32) {
    %c0_i32 = arith.constant 0 : i32
    return %arg0, %arg2 : i32, i32
  }
  func.func @transform_1(%arg0: i32, %arg1: i32, %arg2: i32) -> (i32, i32) {
    %c0_i32 = arith.constant 0 : i32
    return %arg2, %arg1 : i32, i32
  }
  func.func @transform_2(%arg0: i32, %arg1: i32, %arg2: i32) -> (i32, i32) {
    %c0_i32 = arith.constant 0 : i32
    %c0_i32_0 = arith.constant 0 : i32
    return %c0_i32, %arg1 : i32, i32
  }
  func.func @transform_3(%arg0: i32, %arg1: i32, %arg2: i32) -> (i32, i32) {
    %c0_i32 = arith.constant 0 : i32
    return %arg0, %arg1 : i32, i32
  }
}

</mosaic_0001>

<bundles_post_ra>
// kernel: wrn_bottleneck_forward.2
= control target key start
LH: loop header
LB: loop body
LE: loop exit
PB: predicated region body
PF: predicated region fallthrough
CT: control target
= control target key end

     0   :  { %s625_s1 = inlined_call_operand.vmem [shape: f32[128,128], index: 1, kind: input, shape index: {}]   ;;  %s626_s0 = inlined_call_operand.vmem [shape: f32[128,128], index: 0, kind: input, shape index: {}]   ;;  %s627_s2 = inlined_call_operand.vmem [shape: f32[1,128], index: 2, kind: input, shape index: {}]   ;;  %s628_s3 = inlined_call_operand.vmem [shape: f32[128,128], index: 3, kind: output, shape index: {}]  }
   0x1   :  { %v81_v0 = vld [vmem:[%s625_s1 + $0x78] sm:$0xff]  ;;  %v80_v1 = vld [vmem:[%s625_s1 + $0x70] sm:$0xff]  ;;  %v79_v2 = vld [vmem:[%s625_s1 + $0x68] sm:$0xff] }
   0x2   :  { %370 = vmatprep.subr.mxu0 %v81_v0  ;;  %426 = vmatprep.subr.mxu1 %v81_v0  ;;  %v78_v3 = vld [vmem:[%s625_s1 + $0x60] sm:$0xff]  ;;  %v77_v4 = vld [vmem:[%s625_s1 + $0x58] sm:$0xff]  ;;  %v76_v5 = vld [vmem:[%s625_s1 + $0x50] sm:$0xff] }
   0x3   :  { %371 = vmatpush3.msra.mxu0 %v81_v0  ;;  %442 = vmatpush3.msra.mxu1 %v81_v0  ;;  %v75_v6 = vld [vmem:[%s625_s1 + $0x48] sm:$0xff]  ;;  %v74_v7 = vld [vmem:[%s625_s1 + $0x40] sm:$0xff]  ;;  %v73_v8 = vld [vmem:[%s625_s1 + $0x38] sm:$0xff] }
   0x4   :  { %372 = vmatprep.subr.mxu0 %v80_v1  ;;  %427 = vmatprep.subr.mxu1 %v80_v1  ;;  %v72_v9 = vld [vmem:[%s625_s1 + $0x30] sm:$0xff]  ;;  %v71_v10 = vld [vmem:[%s625_s1 + $0x28] sm:$0xff]  ;;  %v70_v11 = vld [vmem:[%s625_s1 + $0x20] sm:$0xff] }
   0x5   :  { %373 = vmatpush3.msra.mxu0 %v80_v1  ;;  %443 = vmatpush3.msra.mxu1 %v80_v1  ;;  %v69_v12 = vld [vmem:[%s625_s1 + $0x18] sm:$0xff]  ;;  %v68_v13 = vld [vmem:[%s625_s1 + $0x10] sm:$0xff]  ;;  %v67_v14 = vld [vmem:[%s625_s1 + $0x8] sm:$0xff] }
   0x6   :  { %374 = vmatprep.subr.mxu0 %v79_v2  ;;  %428 = vmatprep.subr.mxu1 %v79_v2  ;;  %v66_v15 = vld [vmem:[%s625_s1] sm:$0xff]  ;;  %v51_v18 = vld [vmem:[%s626_s0 + $0x8] sm:$0xff]  ;;  %v52_v20 = vld [vmem:[%s626_s0 + $0x10] sm:$0xff] }
   0x7   :  { %375 = vmatpush3.msra.mxu0 %v79_v2  ;;  %444 = vmatpush3.msra.mxu1 %v79_v2  ;;  %v50_v16 = vld [vmem:[%s626_s0] sm:$0xff]  ;;  %v59_v19 = vld [vmem:[%s626_s0 + $0x48] sm:$0xff]  ;;  %v60_v21 = vld [vmem:[%s626_s0 + $0x50] sm:$0xff] }
   0x8   :  { %376 = vmatprep.subr.mxu0 %v78_v3  ;;  %429 = vmatprep.subr.mxu1 %v78_v3  ;;  %v58_v17 = vld [vmem:[%s626_s0 + $0x40] sm:$0xff]  ;;  %v53_v22 = vld [vmem:[%s626_s0 + $0x18] sm:$0xff]  ;;  %v55_v26 = vld [vmem:[%s626_s0 + $0x28] sm:$0xff] }
   0x9   :  { %377 = vmatpush3.msra.mxu0 %v78_v3  ;;  %445 = vmatpush3.msra.mxu1 %v78_v3  ;;  %v61_v23 = vld [vmem:[%s626_s0 + $0x58] sm:$0xff]  ;;  %v54_v24 = vld [vmem:[%s626_s0 + $0x20] sm:$0xff]  ;;  %v63_v27 = vld [vmem:[%s626_s0 + $0x68] sm:$0xff] }
   0xa   :  { %378 = vmatprep.subr.mxu0 %v77_v4  ;;  %430 = vmatprep.subr.mxu1 %v77_v4  ;;  %v62_v25 = vld [vmem:[%s626_s0 + $0x60] sm:$0xff]  ;;  %v56_v28 = vld [vmem:[%s626_s0 + $0x30] sm:$0xff]  ;;  %v57_v30 = vld [vmem:[%s626_s0 + $0x38] sm:$0xff] }
   0xb   :  { %379 = vmatpush3.msra.mxu0 %v77_v4  ;;  %446 = vmatpush3.msra.mxu1 %v77_v4  ;;  %v64_v29 = vld [vmem:[%s626_s0 + $0x70] sm:$0xff]  ;;  %v65_v31 = vld [vmem:[%s626_s0 + $0x78] sm:$0xff]  ;;  %v337_v32 = vld [vmem:[%s627_s2] ss:$0 sm:$0xff] }
   0xc   :  { %380 = vmatprep.subr.mxu0 %v76_v5  ;;  %431 = vmatprep.subr.mxu1 %v76_v5 }
   0xd   :  { %381 = vmatpush3.msra.mxu0 %v76_v5  ;;  %447 = vmatpush3.msra.mxu1 %v76_v5 }
   0xe   :  { %382 = vmatprep.subr.mxu0 %v75_v6  ;;  %432 = vmatprep.subr.mxu1 %v75_v6 }
   0xf   :  { %383 = vmatpush3.msra.mxu0 %v75_v6  ;;  %448 = vmatpush3.msra.mxu1 %v75_v6 }
  0x10   :  { %384 = vmatprep.subr.mxu0 %v74_v7  ;;  %433 = vmatprep.subr.mxu1 %v74_v7 }
  0x11   :  { %385 = vmatpush3.msra.mxu0 %v74_v7  ;;  %449 = vmatpush3.msra.mxu1 %v74_v7 }
  0x12   :  { %386 = vmatprep.subr.mxu0 %v73_v8  ;;  %434 = vmatprep.subr.mxu1 %v73_v8 }
  0x13   :  { %387 = vmatpush3.msra.mxu0 %v73_v8  ;;  %450 = vmatpush3.msra.mxu1 %v73_v8 }
  0x14   :  { %388 = vmatprep.subr.mxu0 %v72_v9  ;;  %435 = vmatprep.subr.mxu1 %v72_v9 }
  0x15   :  { %389 = vmatpush3.msra.mxu0 %v72_v9  ;;  %451 = vmatpush3.msra.mxu1 %v72_v9 }
  0x16   :  { %390 = vmatprep.subr.mxu0 %v71_v10  ;;  %436 = vmatprep.subr.mxu1 %v71_v10 }
  0x17   :  { %391 = vmatpush3.msra.mxu0 %v71_v10  ;;  %452 = vmatpush3.msra.mxu1 %v71_v10 }
  0x18   :  { %392 = vmatprep.subr.mxu0 %v70_v11  ;;  %437 = vmatprep.subr.mxu1 %v70_v11 }
  0x19   :  { %393 = vmatpush3.msra.mxu0 %v70_v11  ;;  %453 = vmatpush3.msra.mxu1 %v70_v11 }
  0x1a   :  { %394 = vmatprep.subr.mxu0 %v69_v12  ;;  %438 = vmatprep.subr.mxu1 %v69_v12 }
  0x1b   :  { %395 = vmatpush3.msra.mxu0 %v69_v12  ;;  %454 = vmatpush3.msra.mxu1 %v69_v12 }
  0x1c   :  { %396 = vmatprep.subr.mxu0 %v68_v13  ;;  %439 = vmatprep.subr.mxu1 %v68_v13 }
  0x1d   :  { %397 = vmatpush3.msra.mxu0 %v68_v13  ;;  %455 = vmatpush3.msra.mxu1 %v68_v13 }
  0x1e   :  { %398 = vmatprep.subr.mxu0 %v67_v14  ;;  %440 = vmatprep.subr.mxu1 %v67_v14 }
  0x1f   :  { %399 = vmatpush3.msra.mxu0 %v67_v14  ;;  %456 = vmatpush3.msra.mxu1 %v67_v14 }
  0x20   :  { %400 = vmatprep.subr.mxu0 %v66_v15  ;;  %441 = vmatprep.subr.mxu1 %v66_v15 }
  0x21   :  { %401 = vmatpush3.msra.mxu0 %v66_v15  ;;  %457 = vmatpush3.msra.mxu1 %v66_v15 }
  0x22   :  { %402 = vmatprep.mubr.f32.mxu0 %v50_v16  ;;  %414 = vmatprep.mubr.f32.mxu1 %v58_v17 }
  0x23   :  { %403 = vmatmul.mubr.f32.vlgmr.msra.gmra.mxu0 %v51_v18  ;;  %415 = vmatmul.mubr.f32.vlgmr.msra.gmra.mxu1 %v59_v19 }
  0x24   :  { %405 = vmatprep.mubr.f32.mxu0 %v52_v20  ;;  %417 = vmatprep.mubr.f32.mxu1 %v60_v21 }
  0x27   :  { %406 = vmatmul.mubr.f32.gmra.mxu0 %v53_v22  ;;  %418 = vmatmul.mubr.f32.gmra.mxu1 %v61_v23 }
  0x28   :  { %408 = vmatprep.mubr.f32.mxu0 %v54_v24  ;;  %420 = vmatprep.mubr.f32.mxu1 %v62_v25 }
  0x2b   :  { %409 = vmatmul.mubr.f32.gmra.mxu0 %v55_v26  ;;  %421 = vmatmul.mubr.f32.gmra.mxu1 %v63_v27 }
  0x2c   :  { %411 = vmatprep.mubr.f32.mxu0 %v56_v28  ;;  %423 = vmatprep.mubr.f32.mxu1 %v64_v29 }
  0x2f   :  { %412 = vmatmul.mubr.f32.gmra.mxu0 %v57_v30  ;;  %424 = vmatmul.mubr.f32.gmra.mxu1 %v65_v31 }
  0xe3   :  { %v404_v33 = vpop.f32.mrf.mxu0  ;;  %v416_v34 = vpop.f32.mrf.mxu1 }
  0xe4   :  { %v286_v35 = vadd.f32 %v404_v33, %v337_v32  ;;  %v294_v36 = vadd.f32 %v416_v34, %v337_v32 }
  0xe5   :  { %v148_v37 = vpop.f32.mrf.mxu0  ;;  %v188_v38 = vpop.f32.mrf.mxu1 }
  0xe6   :  { %v302_v39 = vmax.f32 %v286_v35, 0.0  ;;  %v310_v40 = vmax.f32 %v294_v36, 0.0  ;;  %v285_v41 = vadd.f32 %v337_v32, %v148_v37  ;;  %v293_v42 = vadd.f32 %v337_v32, %v188_v38 }
  0xe7   :  { %v407_v43 = vpop.f32.mrf.mxu0  ;;  %v419_v44 = vpop.f32.mrf.mxu1 }
  0xe8   :  { %318 = vst [vmem:[%s628_s3 + $0x8] sm:$0xff] %v302_v39  ;;  %326 = vst [vmem:[%s628_s3 + $0x48] sm:$0xff] %v310_v40  ;;  %v301_v45 = vmax.f32 %v285_v41, 0.0  ;;  %v309_v46 = vmax.f32 %v293_v42, 0.0  ;;  %v288_v47 = vadd.f32 %v407_v43, %v337_v32  ;;  %v296_v48 = vadd.f32 %v419_v44, %v337_v32 }
  0xe9   :  { %v158_v49 = vpop.f32.mrf.mxu0  ;;  %v198_v50 = vpop.f32.mrf.mxu1 }
  0xea   :  { %317 = vst [vmem:[%s628_s3] sm:$0xff] %v301_v45  ;;  %325 = vst [vmem:[%s628_s3 + $0x40] sm:$0xff] %v309_v46  ;;  %v304_v51 = vmax.f32 %v288_v47, 0.0  ;;  %v312_v52 = vmax.f32 %v296_v48, 0.0  ;;  %v287_v53 = vadd.f32 %v337_v32, %v158_v49  ;;  %v295_v54 = vadd.f32 %v337_v32, %v198_v50 }
  0xeb   :  { %v410_v55 = vpop.f32.mrf.mxu0  ;;  %v422_v56 = vpop.f32.mrf.mxu1 }
  0xec   :  { %320 = vst [vmem:[%s628_s3 + $0x18] sm:$0xff] %v304_v51  ;;  %328 = vst [vmem:[%s628_s3 + $0x58] sm:$0xff] %v312_v52  ;;  %v303_v57 = vmax.f32 %v287_v53, 0.0  ;;  %v311_v58 = vmax.f32 %v295_v54, 0.0  ;;  %v290_v59 = vadd.f32 %v410_v55, %v337_v32  ;;  %v298_v60 = vadd.f32 %v422_v56, %v337_v32 }
  0xed   :  { %v168_v61 = vpop.f32.mrf.mxu0  ;;  %v208_v62 = vpop.f32.mrf.mxu1 }
  0xee   :  { %319 = vst [vmem:[%s628_s3 + $0x10] sm:$0xff] %v303_v57  ;;  %327 = vst [vmem:[%s628_s3 + $0x50] sm:$0xff] %v311_v58  ;;  %v306_v63 = vmax.f32 %v290_v59, 0.0  ;;  %v314_v0 = vmax.f32 %v298_v60, 0.0  ;;  %v289_v1 = vadd.f32 %v337_v32, %v168_v61  ;;  %v297_v2 = vadd.f32 %v337_v32, %v208_v62 }
  0xef   :  { %v413_v3 = vpop.f32.mrf.mxu0  ;;  %v425_v4 = vpop.f32.mrf.mxu1 }
  0xf0   :  { %322 = vst [vmem:[%s628_s3 + $0x28] sm:$0xff] %v306_v63  ;;  %330 = vst [vmem:[%s628_s3 + $0x68] sm:$0xff] %v314_v0  ;;  %v305_v5 = vmax.f32 %v289_v1, 0.0  ;;  %v313_v6 = vmax.f32 %v297_v2, 0.0  ;;  %v292_v7 = vadd.f32 %v413_v3, %v337_v32  ;;  %v300_v8 = vadd.f32 %v425_v4, %v337_v32 }
  0xf1   :  { %v178_v9 = vpop.f32.mrf.mxu0  ;;  %v218_v10 = vpop.f32.mrf.mxu1 }
  0xf2   :  { %321 = vst [vmem:[%s628_s3 + $0x20] sm:$0xff] %v305_v5  ;;  %329 = vst [vmem:[%s628_s3 + $0x60] sm:$0xff] %v313_v6  ;;  %v308_v11 = vmax.f32 %v292_v7, 0.0  ;;  %v316_v12 = vmax.f32 %v300_v8, 0.0  ;;  %v291_v13 = vadd.f32 %v337_v32, %v178_v9  ;;  %v299_v14 = vadd.f32 %v337_v32, %v218_v10 }
  0xf4   :  { %324 = vst [vmem:[%s628_s3 + $0x38] sm:$0xff] %v308_v11  ;;  %332 = vst [vmem:[%s628_s3 + $0x78] sm:$0xff] %v316_v12  ;;  %v307_v15 = vmax.f32 %v291_v13, 0.0  ;;  %v315_v16 = vmax.f32 %v299_v14, 0.0 }
  0xf6   :  { %323 = vst [vmem:[%s628_s3 + $0x30] sm:$0xff] %v307_v15  ;;  %331 = vst [vmem:[%s628_s3 + $0x70] sm:$0xff] %v315_v16 }

// kernel: wrn_bottleneck_forward.3
= control target key start
LH: loop header
LB: loop body
LE: loop exit
PB: predicated region body
PF: predicated region fallthrough
CT: control target
= control target key end

     0   :  { %10 = vsyncpa [#allocation3], 0  ;;  %s2627_s18 = smov 0   ;;  %s2629_s19 = smov 0   ;;  %s2908_s0 = inlined_call_operand.vmem [shape: f32[1,1,2,10,10,128], index: 0, kind: input, shape index: {}]   ;;  %s2909_s1 = inlined_call_operand.hbm [shape: f32[3,3,128,128], index: 1, kind: input, shape index: {}]   ;;  %s2910_s2 = inlined_call_operand.vmem [shape: f32[1,128], index: 2, kind: input, shape index: {}]   ;;  %s2911_s3 = inlined_call_operand.vmem [shape: f32[128,128], index: 3, kind: input, shape index: {}]   ;;  %s2912_s4 = inlined_call_operand.vmem [shape: f32[1,128], index: 4, kind: input, shape index: {}]   ;;  %s2913_s5 = inlined_call_operand.vmem [shape: f32[2,8,8,128], index: 5, kind: output, shape index: {}]  }
   0x1   :  { %s2631_s20 = smov 0  }
   0x2 LB: > { %s1759_s21 = sadd.s32 4294967295, %s2592_s20   ;;  %s28_s22 = sadd.s32 1, %s2588_s19  ;;  %s2592_s20 = sphi %s2631_s20, %s16_s20   ;;  %s2588_s19 = sphi %s2629_s19, %s2929_s19   ;;  %s2584_s18 = sphi %s2627_s18, %s2928_s18  }
   0x3   : > { %p30_p0 = scmp.ge.s32.totalorder %s28_s22, 2  ;;  %p1761_p1 = scmp.ge.s32.totalorder %s2592_s20, 1 }
   0x4   : > { %p171_p2 = scmp.lt.s32.totalorder %s2592_s20, 3  ;;  %p2652_p4 = scmp.eq.s32.totalorder %s1759_s21, 0 }
   0x5   : > { %s2931_s22 = smov (%p30_p0, %s28_s22), 0  ;;  %s2594_s25 = smov [#allocation2]  }
   0x6   : > { %p2648_p3 = pnand %p1761_p1, %p171_p2  ;;  %s183_s26 = sshll.u32 %s2594_s25, 4  ;;  %s184_s26 = int_to_ptr.vmem [resolvable:$true] %s183_s26 }
   0x7   : > { %s2551_s27 = scalar_lea.vmem %s184_s26, 18432  ;;  %p2559_p11 = scmp.lt.s32.totalorder %s184_s26, %s184_s26 }
   0x8   : > { %p2507_p5 = pneg %p2648_p3  ;;  %p2552_p8 = scmp.ne.s32.totalorder %s184_s26, %s2551_s27 }
   0x9   : > { %p2560_p12 = scmp.lt.s32.totalorder %s2551_s27, %s2551_s27 }
   0xa   : > { %p2508_p6 = pnand %p2652_p4, %p2507_p5 }
   0xb   : > { %p2561_p13 = por %p2560_p12, %p2559_p11 }
   0xc   : > { %p2542_p7 = pneg %p2508_p6 }
   0xe   : > { %p2554_p9 = pnand %p2552_p8, %p2542_p7 }
  0x10   : > { %p2555_p10 = pneg %p2554_p9 }
  0x12   : > { %p2562_p0 = pnand %p2561_p13, %p2555_p10 }
  0x14   : > { %2565 = shalt.err (!%p2562_p0)
}
  0x15   : > { %s2595_s28 = smov 128   ;;  %s2596_s29 = smov 8  }
  0x16   : > { %2510 = dma.hbm_to_vmem [thread:$0]  (!%p2508_p6), %s2909_s1, 18432, %s184_s26, [#allocation3], %s2595_s28, %s2595_s28, %s2596_s29  }
  0x17   : > { %216 = sbr.rel (%p2648_p3) target bundleno = 628 (0x274), region = 40 }
  0x1c   : > { %2579 = dma.done.wait (%p2652_p4), [#allocation3], 18432  }
  0x1d   : > { %2581 = vsyncadd (%p2652_p4), [#allocation3], 4294948864  ;;  %v314_v0 = vld [vmem:[#allocation2 + $0xf8] sm:$0xff]  ;;  %v313_v2 = vld [vmem:[#allocation2 + $0xf0] sm:$0xff]  ;;  %p248_p1 = scmp.lt.s32.totalorder %s2584_s18, 1 }
  0x1e   : > { %v289_v1 = vld [vmem:[#allocation2 + $0x78] sm:$0xff]  ;;  %2062 = vmatprep.subr.mxu0 %v314_v0  ;;  %v288_v3 = vld [vmem:[#allocation2 + $0x70] sm:$0xff]  ;;  %v312_v4 = vld [vmem:[#allocation2 + $0xe8] sm:$0xff] }
  0x1f   : > { %2106 = vmatprep.subr.mxu1 %v289_v1  ;;  %2063 = vmatpush3.msra.mxu0 %v314_v0  ;;  %v287_v5 = vld [vmem:[#allocation2 + $0x68] sm:$0xff]  ;;  %v311_v6 = vld [vmem:[#allocation2 + $0xe0] sm:$0xff]  ;;  %v310_v8 = vld [vmem:[#allocation2 + $0xd8] sm:$0xff]  ;;  %s2933_s18 = smov (!%p248_p1, %s2584_s18), 1 }
  0x20   : > { %2107 = vmatpush3.msra.mxu1 %v289_v1  ;;  %2064 = vmatprep.subr.mxu0 %v313_v2  ;;  %v286_v7 = vld [vmem:[#allocation2 + $0x60] sm:$0xff]  ;;  %v285_v9 = vld [vmem:[#allocation2 + $0x58] sm:$0xff]  ;;  %v309_v10 = vld [vmem:[#allocation2 + $0xd0] sm:$0xff]  ;;  %s2502_s7 = smul.u32 160, %s2933_s18  ;;  %s1821_s28 = sshll.u32 %s2933_s18, 6 }
  0x21   : > { %2108 = vmatprep.subr.mxu1 %v288_v3  ;;  %2065 = vmatpush3.msra.mxu0 %v313_v2  ;;  %v284_v11 = vld [vmem:[#allocation2 + $0x50] sm:$0xff]  ;;  %v308_v12 = vld [vmem:[#allocation2 + $0xc8] sm:$0xff]  ;;  %v307_v14 = vld [vmem:[#allocation2 + $0xc0] sm:$0xff]  ;;  %s261_s8 = scalar_lea.vmem %s2913_s5, %s1821_s28 }
  0x22   : > { %2109 = vmatpush3.msra.mxu1 %v288_v3  ;;  %2066 = vmatprep.subr.mxu0 %v312_v4  ;;  %v283_v13 = vld [vmem:[#allocation2 + $0x48] sm:$0xff]  ;;  %v282_v15 = vld [vmem:[#allocation2 + $0x40] sm:$0xff]  ;;  %v306_v16 = vld [vmem:[#allocation2 + $0xb8] sm:$0xff]  ;;  %s2677_s10 = scalar_lea.vmem %s2908_s0, %s2502_s7 }
  0x23   : > { %2110 = vmatprep.subr.mxu1 %v287_v5  ;;  %2067 = vmatpush3.msra.mxu0 %v312_v4  ;;  %v281_v17 = vld [vmem:[#allocation2 + $0x38] sm:$0xff]  ;;  %v305_v18 = vld [vmem:[#allocation2 + $0xb0] sm:$0xff]  ;;  %v304_v20 = vld [vmem:[#allocation2 + $0xa8] sm:$0xff] }
  0x24   : > { %2111 = vmatpush3.msra.mxu1 %v287_v5  ;;  %2068 = vmatprep.subr.mxu0 %v311_v6  ;;  %v280_v19 = vld [vmem:[#allocation2 + $0x30] sm:$0xff]  ;;  %v279_v21 = vld [vmem:[#allocation2 + $0x28] sm:$0xff]  ;;  %v303_v22 = vld [vmem:[#allocation2 + $0xa0] sm:$0xff] }
  0x25   : > { %2112 = vmatprep.subr.mxu1 %v286_v7  ;;  %2069 = vmatpush3.msra.mxu0 %v311_v6  ;;  %v278_v23 = vld [vmem:[#allocation2 + $0x20] sm:$0xff]  ;;  %v302_v24 = vld [vmem:[#allocation2 + $0x98] sm:$0xff]  ;;  %v301_v26 = vld [vmem:[#allocation2 + $0x90] sm:$0xff] }
  0x26   : > { %2113 = vmatpush3.msra.mxu1 %v286_v7  ;;  %2070 = vmatprep.subr.mxu0 %v310_v8  ;;  %v277_v25 = vld [vmem:[#allocation2 + $0x18] sm:$0xff]  ;;  %v276_v27 = vld [vmem:[#allocation2 + $0x10] sm:$0xff]  ;;  %v300_v28 = vld [vmem:[#allocation2 + $0x88] sm:$0xff] }
  0x27   : > { %2114 = vmatprep.subr.mxu1 %v285_v9  ;;  %2071 = vmatpush3.msra.mxu0 %v310_v8  ;;  %v275_v29 = vld [vmem:[#allocation2 + $0x8] sm:$0xff]  ;;  %v299_v30 = vld [vmem:[#allocation2 + $0x80] sm:$0xff]  ;;  %v2682_v34 = vld [vmem:[%s2677_s10 + $0x11] sm:$0xff] }
  0x28   : > { %2115 = vmatpush3.msra.mxu1 %v285_v9  ;;  %2072 = vmatprep.subr.mxu0 %v309_v10  ;;  %v274_v31 = vld [vmem:[#allocation2] sm:$0xff]  ;;  %v2685_v35 = vld [vmem:[%s2677_s10 + $0x10] sm:$0xff]  ;;  %v549_v36 = vld [vmem:[#allocation2 + $0x178] sm:$0xff] }
  0x29   : > { %2116 = vmatprep.subr.mxu1 %v284_v11  ;;  %2073 = vmatpush3.msra.mxu0 %v309_v10  ;;  %v290_v32 = vld [vmem:[%s2677_s10 + $0x1] sm:$0xff]  ;;  %v690_v37 = vld [vmem:[#allocation2 + $0x1f8] sm:$0xff]  ;;  %v548_v38 = vld [vmem:[#allocation2 + $0x170] sm:$0xff] }
  0x2a   : > { %2117 = vmatpush3.msra.mxu1 %v284_v11  ;;  %2074 = vmatprep.subr.mxu0 %v308_v12  ;;  %v266_v33 = vld [vmem:[%s2677_s10] sm:$0xff]  ;;  %v689_v39 = vld [vmem:[#allocation2 + $0x1f0] sm:$0xff]  ;;  %v547_v40 = vld [vmem:[#allocation2 + $0x168] sm:$0xff] }
  0x2b   : > { %2118 = vmatprep.subr.mxu1 %v283_v13  ;;  %2075 = vmatpush3.msra.mxu0 %v308_v12  ;;  %v688_v41 = vld [vmem:[#allocation2 + $0x1e8] sm:$0xff]  ;;  %v546_v42 = vld [vmem:[#allocation2 + $0x160] sm:$0xff]  ;;  %v545_v44 = vld [vmem:[#allocation2 + $0x158] sm:$0xff] }
  0x2c   : > { %2119 = vmatpush3.msra.mxu1 %v283_v13  ;;  %2076 = vmatprep.subr.mxu0 %v307_v14  ;;  %v687_v43 = vld [vmem:[#allocation2 + $0x1e0] sm:$0xff]  ;;  %v686_v45 = vld [vmem:[#allocation2 + $0x1d8] sm:$0xff]  ;;  %v544_v46 = vld [vmem:[#allocation2 + $0x150] sm:$0xff] }
  0x2d   : > { %2120 = vmatprep.subr.mxu1 %v282_v15  ;;  %2077 = vmatpush3.msra.mxu0 %v307_v14  ;;  %v685_v47 = vld [vmem:[#allocation2 + $0x1d0] sm:$0xff]  ;;  %v543_v48 = vld [vmem:[#allocation2 + $0x148] sm:$0xff]  ;;  %v542_v50 = vld [vmem:[#allocation2 + $0x140] sm:$0xff] }
  0x2e   : > { %2121 = vmatpush3.msra.mxu1 %v282_v15  ;;  %2078 = vmatprep.subr.mxu0 %v306_v16  ;;  %v684_v49 = vld [vmem:[#allocation2 + $0x1c8] sm:$0xff]  ;;  %v683_v51 = vld [vmem:[#allocation2 + $0x1c0] sm:$0xff]  ;;  %v541_v52 = vld [vmem:[#allocation2 + $0x138] sm:$0xff] }
  0x2f   : > { %2122 = vmatprep.subr.mxu1 %v281_v17  ;;  %2079 = vmatpush3.msra.mxu0 %v306_v16  ;;  %v2690_v53 = vld [vmem:[%s2677_s10 + $0x21] sm:$0xff]  ;;  %v540_v55 = vld [vmem:[#allocation2 + $0x130] sm:$0xff]  ;;  %v682_v56 = vld [vmem:[#allocation2 + $0x1b8] sm:$0xff] }
  0x30   : > { %2123 = vmatpush3.msra.mxu1 %v281_v17  ;;  %2080 = vmatprep.subr.mxu0 %v305_v18  ;;  %v2693_v54 = vld [vmem:[%s2677_s10 + $0x20] sm:$0xff]  ;;  %v2697_v57 = vld [vmem:[%s2677_s10 + $0x31] sm:$0xff]  ;;  %v539_v59 = vld [vmem:[#allocation2 + $0x128] sm:$0xff] }
  0x31   : > { %2124 = vmatprep.subr.mxu1 %v280_v19  ;;  %2081 = vmatpush3.msra.mxu0 %v305_v18  ;;  %v2700_v58 = vld [vmem:[%s2677_s10 + $0x30] sm:$0xff]  ;;  %v2706_v61 = vld [vmem:[%s2677_s10 + $0x41] sm:$0xff]  ;;  %v537_v3 = vld [vmem:[#allocation2 + $0x118] sm:$0xff] }
  0x32   : > { %2125 = vmatpush3.msra.mxu1 %v280_v19  ;;  %2082 = vmatprep.subr.mxu0 %v304_v20  ;;  %v681_v60 = vld [vmem:[#allocation2 + $0x1b0] sm:$0xff]  ;;  %v2709_v62 = vld [vmem:[%s2677_s10 + $0x40] sm:$0xff]  ;;  %v680_v0 = vld [vmem:[#allocation2 + $0x1a8] sm:$0xff] }
  0x33   : > { %2126 = vmatprep.subr.mxu1 %v279_v21  ;;  %2083 = vmatpush3.msra.mxu0 %v304_v20  ;;  %v538_v63 = vld [vmem:[#allocation2 + $0x120] sm:$0xff]  ;;  %v2712_v1 = vld [vmem:[%s2677_s10 + $0x51] sm:$0xff]  ;;  %v535_v11 = vld [vmem:[#allocation2 + $0x108] sm:$0xff] }
  0x34   : > { %2127 = vmatpush3.msra.mxu1 %v279_v21  ;;  %2084 = vmatprep.subr.mxu0 %v303_v22  ;;  %v2715_v2 = vld [vmem:[%s2677_s10 + $0x50] sm:$0xff]  ;;  %v679_v4 = vld [vmem:[#allocation2 + $0x1a0] sm:$0xff]  ;;  %v678_v8 = vld [vmem:[#allocation2 + $0x198] sm:$0xff] }
  0x35   : > { %2128 = vmatprep.subr.mxu1 %v278_v23  ;;  %2085 = vmatpush3.msra.mxu0 %v303_v22  ;;  %v2722_v5 = vld [vmem:[%s2677_s10 + $0x61] sm:$0xff]  ;;  %v536_v7 = vld [vmem:[#allocation2 + $0x110] sm:$0xff]  ;;  %v828_v18 = vld [vmem:[#allocation2 + $0x278] sm:$0xff] }
  0x36   : > { %2129 = vmatpush3.msra.mxu1 %v278_v23  ;;  %2086 = vmatprep.subr.mxu0 %v302_v24  ;;  %v2725_v6 = vld [vmem:[%s2677_s10 + $0x60] sm:$0xff]  ;;  %v2728_v9 = vld [vmem:[%s2677_s10 + $0x71] sm:$0xff]  ;;  %v676_v14 = vld [vmem:[#allocation2 + $0x188] sm:$0xff] }
  0x37   : > { %2130 = vmatprep.subr.mxu1 %v277_v25  ;;  %2087 = vmatpush3.msra.mxu0 %v302_v24  ;;  %v2731_v10 = vld [vmem:[%s2677_s10 + $0x70] sm:$0xff]  ;;  %v534_v13 = vld [vmem:[#allocation2 + $0x100] sm:$0xff]  ;;  %v966_v20 = vld [vmem:[#allocation2 + $0x2f8] sm:$0xff] }
  0x38   : > { %2131 = vmatpush3.msra.mxu1 %v277_v25  ;;  %2088 = vmatprep.subr.mxu0 %v301_v26  ;;  %v677_v12 = vld [vmem:[#allocation2 + $0x190] sm:$0xff]  ;;  %v525_v15 = vld [vmem:[%s2677_s10 + $0x2] sm:$0xff] }
  0x39   : > { %2132 = vmatprep.subr.mxu1 %v276_v27  ;;  %2089 = vmatpush3.msra.mxu0 %v301_v26  ;;  %v2739_v16 = vld [vmem:[%s2677_s10 + $0x12] sm:$0xff]  ;;  %v675_v17 = vld [vmem:[#allocation2 + $0x180] sm:$0xff]  ;;  %v826_v23 = vld [vmem:[#allocation2 + $0x268] sm:$0xff] }
  0x3a   : > { %2133 = vmatpush3.msra.mxu1 %v276_v27  ;;  %2090 = vmatprep.subr.mxu0 %v300_v28  ;;  %v827_v19 = vld [vmem:[#allocation2 + $0x270] sm:$0xff]  ;;  %v2744_v21 = vld [vmem:[%s2677_s10 + $0x22] sm:$0xff] }
  0x3b   : > { %2134 = vmatprep.subr.mxu1 %v275_v29  ;;  %2091 = vmatpush3.msra.mxu0 %v300_v28  ;;  %v2748_v22 = vld [vmem:[%s2677_s10 + $0x32] sm:$0xff]  ;;  %v825_v25 = vld [vmem:[#allocation2 + $0x260] sm:$0xff]  ;;  %v964_v26 = vld [vmem:[#allocation2 + $0x2e8] sm:$0xff] }
  0x3c   : > { %2135 = vmatpush3.msra.mxu1 %v275_v29  ;;  %2092 = vmatprep.subr.mxu0 %v299_v30  ;;  %v965_v24 = vld [vmem:[#allocation2 + $0x2f0] sm:$0xff]  ;;  %v2754_v27 = vld [vmem:[%s2677_s10 + $0x42] sm:$0xff]  ;;  %v824_v29 = vld [vmem:[#allocation2 + $0x258] sm:$0xff] }
  0x3d   : > { %2136 = vmatprep.subr.mxu1 %v274_v31  ;;  %2093 = vmatpush3.msra.mxu0 %v299_v30  ;;  %v2757_v28 = vld [vmem:[%s2677_s10 + $0x52] sm:$0xff]  ;;  %v963_v30 = vld [vmem:[#allocation2 + $0x2e0] sm:$0xff] }
  0x3e   : > { %2094 = vmatprep.mubr.f32.mxu0 %v290_v32  ;;  %2137 = vmatpush3.msra.mxu1 %v274_v31  ;;  %v823_v31 = vld [vmem:[#allocation2 + $0x250] sm:$0xff]  ;;  %v962_v32 = vld [vmem:[#allocation2 + $0x2d8] sm:$0xff] }
  0x3f   : > { %2138 = vmatprep.mubr.f32.mxu1 %v266_v33  ;;  %2095 = vmatmul.mubr.f32.vlgmr.msra.gmra.mxu0 %v2682_v34  ;;  %v2764_v33 = vld [vmem:[%s2677_s10 + $0x62] sm:$0xff] }
  0x40   : > { %2139 = vmatmul.mubr.f32.vlgmr.msra.gmra.mxu1 %v2685_v35  ;;  %2150 = vmatprep.subr.mxu0 %v549_v36 }
  0x41   : > { %2194 = vmatprep.subr.mxu1 %v690_v37  ;;  %2151 = vmatpush3.msra.mxu0 %v549_v36  ;;  %v822_v36 = vld [vmem:[#allocation2 + $0x248] sm:$0xff] }
  0x42   : > { %2195 = vmatpush3.msra.mxu1 %v690_v37  ;;  %2152 = vmatprep.subr.mxu0 %v548_v38  ;;  %v961_v37 = vld [vmem:[#allocation2 + $0x2d0] sm:$0xff] }
  0x43   : > { %2196 = vmatprep.subr.mxu1 %v689_v39  ;;  %2153 = vmatpush3.msra.mxu0 %v548_v38  ;;  %v821_v38 = vld [vmem:[#allocation2 + $0x240] sm:$0xff] }
  0x44   : > { %2197 = vmatpush3.msra.mxu1 %v689_v39  ;;  %2154 = vmatprep.subr.mxu0 %v547_v40  ;;  %v2773_v39 = vld [vmem:[%s2677_s10 + $0x80] sm:$0xff] }
  0x45   : > { %2198 = vmatprep.subr.mxu1 %v688_v41  ;;  %2155 = vmatpush3.msra.mxu0 %v547_v40  ;;  %v960_v40 = vld [vmem:[#allocation2 + $0x2c8] sm:$0xff] }
  0x46   : > { %2199 = vmatpush3.msra.mxu1 %v688_v41  ;;  %2156 = vmatprep.subr.mxu0 %v546_v42  ;;  %v820_v41 = vld [vmem:[#allocation2 + $0x238] sm:$0xff] }
  0x47   : > { %2200 = vmatprep.subr.mxu1 %v687_v43  ;;  %2157 = vmatpush3.msra.mxu0 %v546_v42  ;;  %v959_v42 = vld [vmem:[#allocation2 + $0x2c0] sm:$0xff] }
  0x48   : > { %2201 = vmatpush3.msra.mxu1 %v687_v43  ;;  %2158 = vmatprep.subr.mxu0 %v545_v44  ;;  %v819_v43 = vld [vmem:[#allocation2 + $0x230] sm:$0xff] }
  0x49   : > { %2202 = vmatprep.subr.mxu1 %v686_v45  ;;  %2159 = vmatpush3.msra.mxu0 %v545_v44  ;;  %v958_v44 = vld [vmem:[#allocation2 + $0x2b8] sm:$0xff] }
  0x4a   : > { %2203 = vmatpush3.msra.mxu1 %v686_v45  ;;  %2160 = vmatprep.subr.mxu0 %v544_v46  ;;  %v818_v45 = vld [vmem:[#allocation2 + $0x228] sm:$0xff] }
  0x4b   : > { %2204 = vmatprep.subr.mxu1 %v685_v47  ;;  %2161 = vmatpush3.msra.mxu0 %v544_v46  ;;  %v957_v46 = vld [vmem:[#allocation2 + $0x2b0] sm:$0xff] }
  0x4c   : > { %2205 = vmatpush3.msra.mxu1 %v685_v47  ;;  %2162 = vmatprep.subr.mxu0 %v543_v48  ;;  %v817_v47 = vld [vmem:[#allocation2 + $0x220] sm:$0xff] }
  0x4d   : > { %2206 = vmatprep.subr.mxu1 %v684_v49  ;;  %2163 = vmatpush3.msra.mxu0 %v543_v48  ;;  %v956_v48 = vld [vmem:[#allocation2 + $0x2a8] sm:$0xff] }
  0x4e   : > { %2207 = vmatpush3.msra.mxu1 %v684_v49  ;;  %2164 = vmatprep.subr.mxu0 %v542_v50  ;;  %v816_v49 = vld [vmem:[#allocation2 + $0x218] sm:$0xff] }
  0x4f   : > { %2208 = vmatprep.subr.mxu1 %v683_v51  ;;  %2165 = vmatpush3.msra.mxu0 %v542_v50  ;;  %v955_v50 = vld [vmem:[#allocation2 + $0x2a0] sm:$0xff] }
  0x50   : > { %2209 = vmatpush3.msra.mxu1 %v683_v51  ;;  %2166 = vmatprep.subr.mxu0 %v541_v52  ;;  %v815_v51 = vld [vmem:[#allocation2 + $0x210] sm:$0xff] }
  0x51   : > { %2097 = vmatprep.mubr.f32.mxu0 %v2690_v53  ;;  %2167 = vmatpush3.msra.mxu0 %v541_v52  ;;  %v954_v52 = vld [vmem:[#allocation2 + $0x298] sm:$0xff] }
  0x52   : > { %2141 = vmatprep.mubr.f32.mxu1 %v2693_v54  ;;  %2168 = vmatprep.subr.mxu0 %v540_v55 }
  0x53   : > { %2210 = vmatprep.subr.mxu1 %v682_v56  ;;  %2098 = vmatmul.mubr.f32.gmra.mxu0 %v2697_v57 }
  0x54   : > { %2142 = vmatmul.mubr.f32.gmra.mxu1 %v2700_v58  ;;  %2169 = vmatpush3.msra.mxu0 %v540_v55  ;;  %v814_v55 = vld [vmem:[#allocation2 + $0x208] sm:$0xff] }
  0x55   : > { %2211 = vmatpush3.msra.mxu1 %v682_v56  ;;  %2170 = vmatprep.subr.mxu0 %v539_v59  ;;  %v953_v56 = vld [vmem:[#allocation2 + $0x290] sm:$0xff] }
  0x56   : > { %2212 = vmatprep.subr.mxu1 %v681_v60  ;;  %2171 = vmatpush3.msra.mxu0 %v539_v59  ;;  %v813_v59 = vld [vmem:[#allocation2 + $0x200] sm:$0xff] }
  0x57   : > { %2213 = vmatpush3.msra.mxu1 %v681_v60  ;;  %2100 = vmatprep.mubr.f32.mxu0 %v2706_v61  ;;  %v952_v60 = vld [vmem:[#allocation2 + $0x288] sm:$0xff] }
  0x58   : > { %2144 = vmatprep.mubr.f32.mxu1 %v2709_v62  ;;  %2172 = vmatprep.subr.mxu0 %v538_v63 }
  0x59   : > { %2214 = vmatprep.subr.mxu1 %v680_v0  ;;  %2101 = vmatmul.mubr.f32.gmra.mxu0 %v2712_v1 }
  0x5a   : > { %2145 = vmatmul.mubr.f32.gmra.mxu1 %v2715_v2  ;;  %2173 = vmatpush3.msra.mxu0 %v538_v63  ;;  %v951_v63 = vld [vmem:[#allocation2 + $0x280] sm:$0xff] }
  0x5b   : > { %2215 = vmatpush3.msra.mxu1 %v680_v0  ;;  %2174 = vmatprep.subr.mxu0 %v537_v3  ;;  %v1107_v0 = vld [vmem:[#allocation2 + $0x378] sm:$0xff] }
  0x5c   : > { %2216 = vmatprep.subr.mxu1 %v679_v4  ;;  %2175 = vmatpush3.msra.mxu0 %v537_v3  ;;  %v1106_v3 = vld [vmem:[#allocation2 + $0x370] sm:$0xff] }
  0x5d   : > { %2217 = vmatpush3.msra.mxu1 %v679_v4  ;;  %2103 = vmatprep.mubr.f32.mxu0 %v2722_v5  ;;  %v1245_v4 = vld [vmem:[#allocation2 + $0x3f8] sm:$0xff] }
  0x5e   : > { %2147 = vmatprep.mubr.f32.mxu1 %v2725_v6  ;;  %2176 = vmatprep.subr.mxu0 %v536_v7 }
  0x5f   : > { %2218 = vmatprep.subr.mxu1 %v678_v8  ;;  %2104 = vmatmul.mubr.f32.gmra.mxu0 %v2728_v9 }
  0x60   : > { %2148 = vmatmul.mubr.f32.gmra.mxu1 %v2731_v10  ;;  %2177 = vmatpush3.msra.mxu0 %v536_v7  ;;  %v1105_v7 = vld [vmem:[#allocation2 + $0x368] sm:$0xff] }
  0x61   : > { %2219 = vmatpush3.msra.mxu1 %v678_v8  ;;  %2178 = vmatprep.subr.mxu0 %v535_v11  ;;  %v1244_v8 = vld [vmem:[#allocation2 + $0x3f0] sm:$0xff] }
  0x62   : > { %2220 = vmatprep.subr.mxu1 %v677_v12  ;;  %2179 = vmatpush3.msra.mxu0 %v535_v11  ;;  %v1243_v11 = vld [vmem:[#allocation2 + $0x3e8] sm:$0xff] }
  0x63   : > { %2221 = vmatpush3.msra.mxu1 %v677_v12  ;;  %2180 = vmatprep.subr.mxu0 %v534_v13  ;;  %v1103_v12 = vld [vmem:[#allocation2 + $0x358] sm:$0xff] }
  0x64   : > { %2222 = vmatprep.subr.mxu1 %v676_v14  ;;  %2181 = vmatpush3.msra.mxu0 %v534_v13  ;;  %v1242_v13 = vld [vmem:[#allocation2 + $0x3e0] sm:$0xff] }
  0x65   : > { %2182 = vmatprep.mubr.f32.mxu0 %v525_v15  ;;  %2223 = vmatpush3.msra.mxu1 %v676_v14  ;;  %v1102_v14 = vld [vmem:[#allocation2 + $0x350] sm:$0xff]  ;;  %v1241_v15 = vld [vmem:[#allocation2 + $0x3d8] sm:$0xff] }
  0x66   : > { %2183 = vmatmul.mubr.f32.vlgmr.msra.gmra.mxu0 %v2739_v16  ;;  %2224 = vmatprep.subr.mxu1 %v675_v17 }
  0x67   : > { %2238 = vmatprep.subr.mxu0 %v828_v18  ;;  %2225 = vmatpush3.msra.mxu1 %v675_v17  ;;  %v1101_v17 = vld [vmem:[#allocation2 + $0x348] sm:$0xff] }
  0x68   : > { %2226 = vmatprep.mubr.f32.mxu1 %v2685_v35  ;;  %2239 = vmatpush3.msra.mxu0 %v828_v18  ;;  %v2767_v35 = vld [vmem:[%s2677_s10 + $0x72] sm:$0xff] }
  0x69   : > { %2227 = vmatmul.mubr.f32.vlgmr.msra.gmra.mxu1 %v2693_v54  ;;  %2240 = vmatprep.subr.mxu0 %v827_v19  ;;  %v1240_v18 = vld [vmem:[#allocation2 + $0x3d0] sm:$0xff] }
  0x6a   : > { %2282 = vmatprep.subr.mxu1 %v966_v20  ;;  %2185 = vmatprep.mubr.f32.mxu0 %v2744_v21 }
  0x6b   : > { %2241 = vmatpush3.msra.mxu0 %v827_v19  ;;  %2283 = vmatpush3.msra.mxu1 %v966_v20  ;;  %v1100_v19 = vld [vmem:[#allocation2 + $0x340] sm:$0xff] }
  0x6c   : > { %2186 = vmatmul.mubr.f32.gmra.mxu0 %v2748_v22  ;;  %2242 = vmatprep.subr.mxu0 %v826_v23  ;;  %v2795_v20 = vld [vmem:[%s2677_s10 + $0x82] sm:$0xff] }
  0x6d   : > { %2284 = vmatprep.subr.mxu1 %v965_v24  ;;  %2229 = vmatprep.mubr.f32.mxu1 %v2700_v58 }
  0x6e   : > { %2243 = vmatpush3.msra.mxu0 %v826_v23  ;;  %2285 = vmatpush3.msra.mxu1 %v965_v24  ;;  %v1239_v23 = vld [vmem:[#allocation2 + $0x3c8] sm:$0xff]  ;;  %v1099_v24 = vld [vmem:[#allocation2 + $0x338] sm:$0xff] }
  0x6f   : > { %2244 = vmatprep.subr.mxu0 %v825_v25  ;;  %2230 = vmatmul.mubr.f32.gmra.mxu1 %v2709_v62 }
  0x70   : > { %2286 = vmatprep.subr.mxu1 %v964_v26  ;;  %2188 = vmatprep.mubr.f32.mxu0 %v2754_v27 }
  0x71   : > { %2245 = vmatpush3.msra.mxu0 %v825_v25  ;;  %2287 = vmatpush3.msra.mxu1 %v964_v26  ;;  %v1238_v25 = vld [vmem:[#allocation2 + $0x3c0] sm:$0xff]  ;;  %v1098_v26 = vld [vmem:[#allocation2 + $0x330] sm:$0xff] }
  0x72   : > { %2189 = vmatmul.mubr.f32.gmra.mxu0 %v2757_v28  ;;  %2246 = vmatprep.subr.mxu0 %v824_v29 }
  0x73   : > { %2288 = vmatprep.subr.mxu1 %v963_v30  ;;  %2232 = vmatprep.mubr.f32.mxu1 %v2715_v2 }
  0x74   : > { %2247 = vmatpush3.msra.mxu0 %v824_v29  ;;  %2289 = vmatpush3.msra.mxu1 %v963_v30  ;;  %v1237_v29 = vld [vmem:[#allocation2 + $0x3b8] sm:$0xff]  ;;  %v1097_v30 = vld [vmem:[#allocation2 + $0x328] sm:$0xff] }
  0x75   : > { %2248 = vmatprep.subr.mxu0 %v823_v31  ;;  %2233 = vmatmul.mubr.f32.gmra.mxu1 %v2725_v6 }
  0x76   : > { %2290 = vmatprep.subr.mxu1 %v962_v32  ;;  %2191 = vmatprep.mubr.f32.mxu0 %v2764_v33 }
  0x77   : > { %2249 = vmatpush3.msra.mxu0 %v823_v31  ;;  %2291 = vmatpush3.msra.mxu1 %v962_v32  ;;  %v1236_v31 = vld [vmem:[#allocation2 + $0x3b0] sm:$0xff]  ;;  %v1096_v32 = vld [vmem:[#allocation2 + $0x320] sm:$0xff] }
  0x78   : > { %2192 = vmatmul.mubr.f32.gmra.mxu0 %v2767_v35  ;;  %2250 = vmatprep.subr.mxu0 %v822_v36 }
  0x79   : > { %2292 = vmatprep.subr.mxu1 %v961_v37  ;;  %2235 = vmatprep.mubr.f32.mxu1 %v2731_v10 }
  0x7a   : > { %2251 = vmatpush3.msra.mxu0 %v822_v36  ;;  %2293 = vmatpush3.msra.mxu1 %v961_v37  ;;  %v1235_v36 = vld [vmem:[#allocation2 + $0x3a8] sm:$0xff]  ;;  %v1095_v37 = vld [vmem:[#allocation2 + $0x318] sm:$0xff] }
  0x7b   : > { %2252 = vmatprep.subr.mxu0 %v821_v38  ;;  %2236 = vmatmul.mubr.f32.gmra.mxu1 %v2773_v39 }
  0x7c   : > { %2294 = vmatprep.subr.mxu1 %v960_v40  ;;  %2253 = vmatpush3.msra.mxu0 %v821_v38  ;;  %v1234_v38 = vld [vmem:[#allocation2 + $0x3a0] sm:$0xff] }
  0x7d   : > { %2295 = vmatpush3.msra.mxu1 %v960_v40  ;;  %2254 = vmatprep.subr.mxu0 %v820_v41  ;;  %v1094_v40 = vld [vmem:[#allocation2 + $0x310] sm:$0xff] }
  0x7e   : > { %2296 = vmatprep.subr.mxu1 %v959_v42  ;;  %2255 = vmatpush3.msra.mxu0 %v820_v41  ;;  %v1233_v41 = vld [vmem:[#allocation2 + $0x398] sm:$0xff] }
  0x7f   : > { %2297 = vmatpush3.msra.mxu1 %v959_v42  ;;  %2256 = vmatprep.subr.mxu0 %v819_v43  ;;  %v1093_v42 = vld [vmem:[#allocation2 + $0x308] sm:$0xff] }
  0x80   : > { %2298 = vmatprep.subr.mxu1 %v958_v44  ;;  %2257 = vmatpush3.msra.mxu0 %v819_v43  ;;  %v1232_v43 = vld [vmem:[#allocation2 + $0x390] sm:$0xff] }
  0x81   : > { %2299 = vmatpush3.msra.mxu1 %v958_v44  ;;  %2258 = vmatprep.subr.mxu0 %v818_v45  ;;  %v1092_v44 = vld [vmem:[#allocation2 + $0x300] sm:$0xff] }
  0x82   : > { %2300 = vmatprep.subr.mxu1 %v957_v46  ;;  %2259 = vmatpush3.msra.mxu0 %v818_v45  ;;  %v1231_v45 = vld [vmem:[#allocation2 + $0x388] sm:$0xff] }
  0x83   : > { %2301 = vmatpush3.msra.mxu1 %v957_v46  ;;  %2260 = vmatprep.subr.mxu0 %v817_v47  ;;  %v1230_v46 = vld [vmem:[#allocation2 + $0x380] sm:$0xff] }
  0x84   : > { %2302 = vmatprep.subr.mxu1 %v956_v48  ;;  %2261 = vmatpush3.msra.mxu0 %v817_v47  ;;  %v1383_v47 = vld [vmem:[#allocation2 + $0x478] sm:$0xff] }
  0x85   : > { %2303 = vmatpush3.msra.mxu1 %v956_v48  ;;  %2262 = vmatprep.subr.mxu0 %v816_v49  ;;  %v1382_v48 = vld [vmem:[#allocation2 + $0x470] sm:$0xff] }
  0x86   : > { %2304 = vmatprep.subr.mxu1 %v955_v50  ;;  %2263 = vmatpush3.msra.mxu0 %v816_v49  ;;  %v1381_v49 = vld [vmem:[#allocation2 + $0x468] sm:$0xff] }
  0x87   : > { %2305 = vmatpush3.msra.mxu1 %v955_v50  ;;  %2264 = vmatprep.subr.mxu0 %v815_v51  ;;  %v1369_v50 = vld [vmem:[#allocation2 + $0x408] sm:$0xff] }
  0x88   : > { %2306 = vmatprep.subr.mxu1 %v954_v52  ;;  %2265 = vmatpush3.msra.mxu0 %v815_v51  ;;  %v1816_v51 = vld [vmem:[%s2677_s10 + $0x92] sm:$0xff] }
  0x89   : > { %2307 = vmatpush3.msra.mxu1 %v954_v52  ;;  %2266 = vmatprep.subr.mxu0 %v814_v55  ;;  %v1535_v52 = vld [vmem:[%s2911_s3 + $0x78] sm:$0xff] }
  0x8a   : > { %2308 = vmatprep.subr.mxu1 %v953_v56  ;;  %2267 = vmatpush3.msra.mxu0 %v814_v55  ;;  %v1529_v55 = vld [vmem:[%s2911_s3 + $0x48] sm:$0xff] }
  0x8b   : > { %2309 = vmatpush3.msra.mxu1 %v953_v56  ;;  %2268 = vmatprep.subr.mxu0 %v813_v59  ;;  %v1528_v56 = vld [vmem:[%s2911_s3 + $0x40] sm:$0xff] }
  0x8c   : > { %2310 = vmatprep.subr.mxu1 %v952_v60  ;;  %2269 = vmatpush3.msra.mxu0 %v813_v59  ;;  %v1527_v59 = vld [vmem:[%s2911_s3 + $0x38] sm:$0xff] }
  0x8d   : > { %2270 = vmatprep.mubr.f32.mxu0 %v2682_v34  ;;  %2311 = vmatpush3.msra.mxu1 %v952_v60  ;;  %v1104_v34 = vld [vmem:[#allocation2 + $0x360] sm:$0xff]  ;;  %v1526_v60 = vld [vmem:[%s2911_s3 + $0x30] sm:$0xff] }
  0x8e   : > { %2271 = vmatmul.mubr.f32.vlgmr.msra.gmra.mxu0 %v2690_v53  ;;  %2312 = vmatprep.subr.mxu1 %v951_v63 }
  0x8f   : > { %2326 = vmatprep.subr.mxu0 %v1107_v0  ;;  %2313 = vmatpush3.msra.mxu1 %v951_v63  ;;  %v1525_v63 = vld [vmem:[%s2911_s3 + $0x28] sm:$0xff] }
  0x90   : > { %2314 = vmatprep.mubr.f32.mxu1 %v2739_v16  ;;  %2327 = vmatpush3.msra.mxu0 %v1107_v0  ;;  %v2789_v16 = vld [vmem:[%s2677_s10 + $0x81] sm:$0xff] }
  0x91   : > { %2315 = vmatmul.mubr.f32.vlgmr.msra.gmra.mxu1 %v2744_v21  ;;  %2328 = vmatprep.subr.mxu0 %v1106_v3  ;;  %v1524_v0 = vld [vmem:[%s2911_s3 + $0x20] sm:$0xff] }
  0x92   : > { %2370 = vmatprep.subr.mxu1 %v1245_v4  ;;  %2273 = vmatprep.mubr.f32.mxu0 %v2697_v57 }
  0x93   : > { %2329 = vmatpush3.msra.mxu0 %v1106_v3  ;;  %2371 = vmatpush3.msra.mxu1 %v1245_v4  ;;  %v1523_v3 = vld [vmem:[%s2911_s3 + $0x18] sm:$0xff]  ;;  %v1522_v4 = vld [vmem:[%s2911_s3 + $0x10] sm:$0xff] }
  0x94   : > { %2274 = vmatmul.mubr.f32.gmra.mxu0 %v2706_v61  ;;  %2330 = vmatprep.subr.mxu0 %v1105_v7 }
  0x95   : > { %2372 = vmatprep.subr.mxu1 %v1244_v8  ;;  %2317 = vmatprep.mubr.f32.mxu1 %v2748_v22 }
  0x96   : > { %2331 = vmatpush3.msra.mxu0 %v1105_v7  ;;  %2373 = vmatpush3.msra.mxu1 %v1244_v8  ;;  %v1521_v7 = vld [vmem:[%s2911_s3 + $0x8] sm:$0xff]  ;;  %v1520_v8 = vld [vmem:[%s2911_s3] sm:$0xff] }
  0x97   : > { %2332 = vmatprep.subr.mxu0 %v1104_v34  ;;  %2318 = vmatmul.mubr.f32.gmra.mxu1 %v2754_v27 }
  0x98   : > { %2374 = vmatprep.subr.mxu1 %v1243_v11  ;;  %2276 = vmatprep.mubr.f32.mxu0 %v2712_v1 }
  0x99   : > { %2333 = vmatpush3.msra.mxu0 %v1104_v34  ;;  %2375 = vmatpush3.msra.mxu1 %v1243_v11 }
  0x9a   : > { %2277 = vmatmul.mubr.f32.gmra.mxu0 %v2722_v5  ;;  %2334 = vmatprep.subr.mxu0 %v1103_v12 }
  0x9b   : > { %2376 = vmatprep.subr.mxu1 %v1242_v13  ;;  %2320 = vmatprep.mubr.f32.mxu1 %v2757_v28 }
  0x9c   : > { %2335 = vmatpush3.msra.mxu0 %v1103_v12  ;;  %2377 = vmatpush3.msra.mxu1 %v1242_v13 }
  0x9d   : > { %2336 = vmatprep.subr.mxu0 %v1102_v14  ;;  %2321 = vmatmul.mubr.f32.gmra.mxu1 %v2764_v33 }
  0x9e   : > { %2378 = vmatprep.subr.mxu1 %v1241_v15  ;;  %2279 = vmatprep.mubr.f32.mxu0 %v2728_v9 }
  0x9f   : > { %2337 = vmatpush3.msra.mxu0 %v1102_v14  ;;  %2379 = vmatpush3.msra.mxu1 %v1241_v15 }
  0xa0   : > { %2280 = vmatmul.mubr.f32.gmra.mxu0 %v2789_v16  ;;  %2338 = vmatprep.subr.mxu0 %v1101_v17 }
  0xa1   : > { %2380 = vmatprep.subr.mxu1 %v1240_v18  ;;  %2323 = vmatprep.mubr.f32.mxu1 %v2767_v35 }
  0xa2   : > { %2339 = vmatpush3.msra.mxu0 %v1101_v17  ;;  %2381 = vmatpush3.msra.mxu1 %v1240_v18 }
  0xa3   : > { %2340 = vmatprep.subr.mxu0 %v1100_v19  ;;  %2324 = vmatmul.mubr.f32.gmra.mxu1 %v2795_v20 }
  0xa4   : > { %2382 = vmatprep.subr.mxu1 %v1239_v23  ;;  %2341 = vmatpush3.msra.mxu0 %v1100_v19 }
  0xa5   : > { %2383 = vmatpush3.msra.mxu1 %v1239_v23  ;;  %2342 = vmatprep.subr.mxu0 %v1099_v24 }
  0xa6   : > { %2384 = vmatprep.subr.mxu1 %v1238_v25  ;;  %2343 = vmatpush3.msra.mxu0 %v1099_v24 }
  0xa7   : > { %2385 = vmatpush3.msra.mxu1 %v1238_v25  ;;  %2344 = vmatprep.subr.mxu0 %v1098_v26 }
  0xa8   : > { %2386 = vmatprep.subr.mxu1 %v1237_v29  ;;  %2345 = vmatpush3.msra.mxu0 %v1098_v26 }
  0xa9   : > { %2387 = vmatpush3.msra.mxu1 %v1237_v29  ;;  %2346 = vmatprep.subr.mxu0 %v1097_v30 }
  0xaa   : > { %2388 = vmatprep.subr.mxu1 %v1236_v31  ;;  %2347 = vmatpush3.msra.mxu0 %v1097_v30 }
  0xab   : > { %2389 = vmatpush3.msra.mxu1 %v1236_v31  ;;  %2348 = vmatprep.subr.mxu0 %v1096_v32 }
  0xac   : > { %2390 = vmatprep.subr.mxu1 %v1235_v36  ;;  %2349 = vmatpush3.msra.mxu0 %v1096_v32 }
  0xad   : > { %2391 = vmatpush3.msra.mxu1 %v1235_v36  ;;  %2350 = vmatprep.subr.mxu0 %v1095_v37 }
  0xae   : > { %2392 = vmatprep.subr.mxu1 %v1234_v38  ;;  %2351 = vmatpush3.msra.mxu0 %v1095_v37 }
  0xaf   : > { %2393 = vmatpush3.msra.mxu1 %v1234_v38  ;;  %2352 = vmatprep.subr.mxu0 %v1094_v40 }
  0xb0   : > { %2394 = vmatprep.subr.mxu1 %v1233_v41  ;;  %2353 = vmatpush3.msra.mxu0 %v1094_v40 }
  0xb1   : > { %2395 = vmatpush3.msra.mxu1 %v1233_v41  ;;  %2354 = vmatprep.subr.mxu0 %v1093_v42 }
  0xb2   : > { %2396 = vmatprep.subr.mxu1 %v1232_v43  ;;  %2355 = vmatpush3.msra.mxu0 %v1093_v42 }
  0xb3   : > { %2397 = vmatpush3.msra.mxu1 %v1232_v43  ;;  %2356 = vmatprep.subr.mxu0 %v1092_v44 }
  0xb4   : > { %2398 = vmatprep.subr.mxu1 %v1231_v45  ;;  %2357 = vmatpush3.msra.mxu0 %v1092_v44 }
  0xb5   : > { %2358 = vmatprep.mubr.f32.mxu0 %v2693_v54  ;;  %2399 = vmatpush3.msra.mxu1 %v1231_v45  ;;  %v1380_v54 = vld [vmem:[#allocation2 + $0x460] sm:$0xff] }
  0xb6   : > { %2359 = vmatmul.mubr.f32.vlgmr.msra.gmra.mxu0 %v2700_v58  ;;  %2400 = vmatprep.subr.mxu1 %v1230_v46  ;;  %v1800_v58 = vld [vmem:[%s2677_s10 + $0x90] sm:$0xff] }
  0xb7   : > { %2414 = vmatprep.subr.mxu0 %v1383_v47  ;;  %2401 = vmatpush3.msra.mxu1 %v1230_v46 }
  0xb8   : > { %2402 = vmatprep.mubr.f32.mxu1 %v2690_v53  ;;  %2415 = vmatpush3.msra.mxu0 %v1383_v47  ;;  %v1379_v53 = vld [vmem:[#allocation2 + $0x458] sm:$0xff] }
  0xb9   : > { %2403 = vmatmul.mubr.f32.vlgmr.msra.gmra.mxu1 %v2697_v57  ;;  %2416 = vmatprep.subr.mxu0 %v1382_v48  ;;  %v1378_v57 = vld [vmem:[#allocation2 + $0x450] sm:$0xff] }
  0xba   : > { %2361 = vmatprep.mubr.f32.mxu0 %v2709_v62  ;;  %2417 = vmatpush3.msra.mxu0 %v1382_v48  ;;  %v1808_v62 = vld [vmem:[%s2677_s10 + $0x91] sm:$0xff] }
  0xbb   : > { %2405 = vmatprep.mubr.f32.mxu1 %v2706_v61  ;;  %2362 = vmatmul.mubr.f32.gmra.mxu0 %v2715_v2  ;;  %v1377_v61 = vld [vmem:[#allocation2 + $0x448] sm:$0xff]  ;;  %v1375_v2 = vld [vmem:[#allocation2 + $0x438] sm:$0xff] }
  0xbc   : > { %2418 = vmatprep.subr.mxu0 %v1381_v49  ;;  %2364 = vmatprep.mubr.f32.mxu0 %v2725_v6  ;;  %v1373_v6 = vld [vmem:[#allocation2 + $0x428] sm:$0xff] }
  0xbd   : > { %2419 = vmatpush3.msra.mxu0 %v1381_v49  ;;  %2406 = vmatmul.mubr.f32.gmra.mxu1 %v2712_v1  ;;  %v1376_v1 = vld [vmem:[#allocation2 + $0x440] sm:$0xff] }
  0xbe   : > { %2420 = vmatprep.subr.mxu0 %v1380_v54  ;;  %2408 = vmatprep.mubr.f32.mxu1 %v2722_v5  ;;  %v1374_v5 = vld [vmem:[#allocation2 + $0x430] sm:$0xff] }
  0xbf   : > { %2421 = vmatpush3.msra.mxu0 %v1380_v54  ;;  %2458 = vmatprep.subr.mxu1 %v1535_v52 }
  0xc0   : > { %2365 = vmatmul.mubr.f32.gmra.mxu0 %v2731_v10  ;;  %2422 = vmatprep.subr.mxu0 %v1379_v53  ;;  %v1371_v10 = vld [vmem:[#allocation2 + $0x418] sm:$0xff] }
  0xc1   : > { %2423 = vmatpush3.msra.mxu0 %v1379_v53  ;;  %2409 = vmatmul.mubr.f32.gmra.mxu1 %v2728_v9  ;;  %v1372_v9 = vld [vmem:[#allocation2 + $0x420] sm:$0xff] }
  0xc2   : > { %2424 = vmatprep.subr.mxu0 %v1378_v57  ;;  %2367 = vmatprep.mubr.f32.mxu0 %v2773_v39  ;;  %v1370_v39 = vld [vmem:[#allocation2 + $0x410] sm:$0xff] }
  0xc3   : > { %2425 = vmatpush3.msra.mxu0 %v1378_v57  ;;  %2411 = vmatprep.mubr.f32.mxu1 %v2789_v16 }
  0xc4   : > { %2368 = vmatmul.mubr.f32.gmra.mxu0 %v1800_v58  ;;  %2426 = vmatprep.subr.mxu0 %v1377_v61 }
  0xc5   : > { %2427 = vmatpush3.msra.mxu0 %v1377_v61  ;;  %2412 = vmatmul.mubr.f32.gmra.mxu1 %v1808_v62 }
  0xc6   : > { %2428 = vmatprep.subr.mxu0 %v1376_v1  ;;  %2446 = vmatprep.mubr.f32.mxu0 %v2744_v21  ;;  %v1368_v21 = vld [vmem:[#allocation2 + $0x400] sm:$0xff] }
  0xc7   : > { %2429 = vmatpush3.msra.mxu0 %v1376_v1  ;;  %2459 = vmatpush3.msra.mxu1 %v1535_v52 }
  0xc8   : > { %2430 = vmatprep.subr.mxu0 %v1375_v2 }
  0xc9   : > { %2431 = vmatpush3.msra.mxu0 %v1375_v2 }
  0xca   : > { %2432 = vmatprep.subr.mxu0 %v1374_v5 }
  0xcb   : > { %2433 = vmatpush3.msra.mxu0 %v1374_v5 }
  0xcc   : > { %2434 = vmatprep.subr.mxu0 %v1373_v6 }
  0xcd   : > { %2435 = vmatpush3.msra.mxu0 %v1373_v6 }
  0xce   : > { %2436 = vmatprep.subr.mxu0 %v1372_v9 }
  0xcf   : > { %2437 = vmatpush3.msra.mxu0 %v1372_v9 }
  0xd0   : > { %2438 = vmatprep.subr.mxu0 %v1371_v10 }
  0xd1   : > { %2439 = vmatpush3.msra.mxu0 %v1371_v10 }
  0xd2   : > { %2440 = vmatprep.subr.mxu0 %v1370_v39 }
  0xd3   : > { %2441 = vmatpush3.msra.mxu0 %v1370_v39 }
  0xd4   : > { %2442 = vmatprep.subr.mxu0 %v1369_v50 }
  0xd5   : > { %2443 = vmatpush3.msra.mxu0 %v1369_v50 }
  0xd6   : > { %2444 = vmatprep.subr.mxu0 %v1368_v21 }
  0xd7   : > { %2445 = vmatpush3.msra.mxu0 %v1368_v21 }
  0xd8   : > { %2447 = vmatmul.mubr.f32.vlgmr.msra.gmra.mxu0 %v2748_v22  ;;  %v1534_v22 = vld [vmem:[%s2911_s3 + $0x70] sm:$0xff] }
  0xd9   : > { %2449 = vmatprep.mubr.f32.mxu0 %v2754_v27  ;;  %2460 = vmatprep.subr.mxu1 %v1534_v22  ;;  %v1533_v27 = vld [vmem:[%s2911_s3 + $0x68] sm:$0xff] }
  0xda   : > { %2461 = vmatpush3.msra.mxu1 %v1534_v22 }
  0xdb   : > { %2462 = vmatprep.subr.mxu1 %v1533_v27 }
  0xdc   : > { %2450 = vmatmul.mubr.f32.gmra.mxu0 %v2757_v28  ;;  %2463 = vmatpush3.msra.mxu1 %v1533_v27  ;;  %v1532_v28 = vld [vmem:[%s2911_s3 + $0x60] sm:$0xff] }
  0xdd   : > { %2452 = vmatprep.mubr.f32.mxu0 %v2764_v33  ;;  %2464 = vmatprep.subr.mxu1 %v1532_v28  ;;  %v1531_v33 = vld [vmem:[%s2911_s3 + $0x58] sm:$0xff] }
  0xde   : > { %2465 = vmatpush3.msra.mxu1 %v1532_v28 }
  0xdf   : > { %2466 = vmatprep.subr.mxu1 %v1531_v33 }
  0xe0   : > { %2453 = vmatmul.mubr.f32.gmra.mxu0 %v2767_v35  ;;  %v1530_v35 = vld [vmem:[%s2911_s3 + $0x50] sm:$0xff]  ;;  %2467 = vmatpush3.msra.mxu1 %v1531_v33 }
  0xe1   : > { %2455 = vmatprep.mubr.f32.mxu0 %v2795_v20  ;;  %2468 = vmatprep.subr.mxu1 %v1530_v35 }
  0xe2   : > { %2469 = vmatpush3.msra.mxu1 %v1530_v35 }
  0xe3   : > { %2470 = vmatprep.subr.mxu1 %v1529_v55 }
  0xe4   : > { %2456 = vmatmul.mubr.f32.gmra.mxu0 %v1816_v51  ;;  %2471 = vmatpush3.msra.mxu1 %v1529_v55 }
  0xe5   : > { %2472 = vmatprep.subr.mxu1 %v1528_v56 }
  0xe6   : > { %2473 = vmatpush3.msra.mxu1 %v1528_v56 }
  0xe7   : > { %2474 = vmatprep.subr.mxu1 %v1527_v59 }
  0xe8   : > { %2475 = vmatpush3.msra.mxu1 %v1527_v59 }
  0xe9   : > { %2476 = vmatprep.subr.mxu1 %v1526_v60 }
  0xea   : > { %2477 = vmatpush3.msra.mxu1 %v1526_v60 }
  0xeb   : > { %2478 = vmatprep.subr.mxu1 %v1525_v63 }
  0xec   : > { %2479 = vmatpush3.msra.mxu1 %v1525_v63 }
  0xed   : > { %2480 = vmatprep.subr.mxu1 %v1524_v0 }
  0xee   : > { %2481 = vmatpush3.msra.mxu1 %v1524_v0 }
  0xef   : > { %2482 = vmatprep.subr.mxu1 %v1523_v3 }
  0xf0   : > { %2483 = vmatpush3.msra.mxu1 %v1523_v3 }
  0xf1   : > { %2484 = vmatprep.subr.mxu1 %v1522_v4 }
  0xf2   : > { %2485 = vmatpush3.msra.mxu1 %v1522_v4 }
  0xf3   : > { %2486 = vmatprep.subr.mxu1 %v1521_v7 }
  0xf4   : > { %2487 = vmatpush3.msra.mxu1 %v1521_v7 }
  0xf5   : > { %2488 = vmatprep.subr.mxu1 %v1520_v8 }
  0xf6   : > { %2489 = vmatpush3.msra.mxu1 %v1520_v8 }
  0xff   : > { %v2096_v34 = vpop.f32.mrf.mxu0 }
 0x100   : > { %v2140_v14 = vpop.f32.mrf.mxu1 }
 0x101   : > { %v381_v11 = vpop.f32.mrf.mxu0  ;;  %v492_v28 = vadd.f32 %v2140_v14, %v2096_v34 }
 0x102   : > { %v486_v16 = vpop.f32.mrf.mxu1 }
 0x103   : > { %v487_v55 = vadd.f32 %v486_v16, %v381_v11 }
 0x113   : > { %v2099_v12 = vpop.f32.mrf.mxu0 }
 0x114   : > { %v2143_v18 = vpop.f32.mrf.mxu1 }
 0x115   : > { %v391_v13 = vpop.f32.mrf.mxu0  ;;  %v502_v59 = vadd.f32 %v2143_v18, %v2099_v12 }
 0x116   : > { %v496_v20 = vpop.f32.mrf.mxu1 }
 0x117   : > { %v497_v3 = vadd.f32 %v496_v20, %v391_v13 }
 0x119   : > { %v2102_v15 = vpop.f32.mrf.mxu0 }
 0x11a   : > { %v2146_v24 = vpop.f32.mrf.mxu1 }
 0x11b   : > { %v401_v17 = vpop.f32.mrf.mxu0  ;;  %v512_v8 = vadd.f32 %v2146_v24, %v2102_v15 }
 0x11c   : > { %v506_v26 = vpop.f32.mrf.mxu1 }
 0x11f   : > { %v2871_v19 = vpop.f32.mrf.mxu0 }
 0x120   : > { %2916 = vst [vmem:[#allocation5_spill] sm:$0xff] %v2871_v19  ;;  %v2149_v30 = vpop.f32.mrf.mxu1 }
 0x121   : > { %v2873_v23 = vpop.f32.mrf.mxu0 }
 0x122   : > { %2917 = vst [vmem:[#allocation6_spill] sm:$0xff] %v2873_v23  ;;  %v516_v32 = vpop.f32.mrf.mxu1 }
 0x126   : > { %v2184_v25 = vpop.f32.mrf.mxu0 }
 0x127   : > { %v656_v56 = vadd.f32 %v2184_v25, %v492_v28  ;;  %v2922_v16 = vld [vmem:[#allocation5_spill] sm:$0xff] }
 0x128   : > { %v616_v29 = vpop.f32.mrf.mxu0  ;;  %v522_v25 = vadd.f32 %v2149_v30, %v2922_v16 }
 0x129   : > { %v2228_v36 = vpop.f32.mrf.mxu1  ;;  %v655_v60 = vadd.f32 %v616_v29, %v487_v55  ;;  %v2923_v55 = vld [vmem:[#allocation6_spill] sm:$0xff] }
 0x12a   : > { %v797_v4 = vadd.f32 %v2228_v36, %v656_v56  ;;  %v517_v13 = vadd.f32 %v516_v32, %v2923_v55 }
 0x12b   : > { %v757_v38 = vpop.f32.mrf.mxu1 }
 0x12c   : > { %v2187_v31 = vpop.f32.mrf.mxu0 }
 0x12d   : > { %v658_v7 = vadd.f32 %v2187_v31, %v502_v59 }
 0x12e   : > { %v626_v37 = vpop.f32.mrf.mxu0 }
 0x12f   : > { %v2231_v41 = vpop.f32.mrf.mxu1 }
 0x130   : > { %v799_v14 = vadd.f32 %v2231_v41, %v658_v7 }
 0x131   : > { %v767_v43 = vpop.f32.mrf.mxu1 }
 0x132   : > { %v2190_v40 = vpop.f32.mrf.mxu0 }
 0x133   : > { %v660_v34 = vadd.f32 %v2190_v40, %v512_v8 }
 0x134   : > { %v636_v42 = vpop.f32.mrf.mxu0 }
 0x135   : > { %v2234_v45 = vpop.f32.mrf.mxu1 }
 0x136   : > { %v801_v24 = vadd.f32 %v2234_v45, %v660_v34 }
 0x137   : > { %v777_v48 = vpop.f32.mrf.mxu1 }
 0x138   : > { %v2193_v44 = vpop.f32.mrf.mxu0 }
 0x139   : > { %v662_v20 = vadd.f32 %v2193_v44, %v522_v25 }
 0x13a   : > { %v646_v46 = vpop.f32.mrf.mxu0 }
 0x13b   : > { %v2237_v54 = vpop.f32.mrf.mxu1 }
 0x13d   : > { %v2875_v57 = vpop.f32.mrf.mxu1 }
 0x13e   : > { %2918 = vst [vmem:[#allocation7_spill] sm:$0xff] %v2875_v57  ;;  %v657_v57 = vadd.f32 %v626_v37, %v497_v3 }
 0x140   : > { %v798_v28 = vadd.f32 %v767_v43, %v657_v57 }
 0x145   : > { %v2924_v32 = vld [vmem:[#allocation7_spill] sm:$0xff] }
 0x14e   : > { %v2272_v47 = vpop.f32.mrf.mxu0 }
 0x14f   : > { %v935_v23 = vadd.f32 %v2272_v47, %v797_v4  ;;  %v661_v47 = vadd.f32 %v646_v46, %v517_v13  ;;  %v1817_v46 = vld [vmem:[%s2910_s2] ss:$0 sm:$0xff] }
 0x150   : > { %v895_v49 = vpop.f32.mrf.mxu0 }
 0x151   : > { %v2316_v58 = vpop.f32.mrf.mxu1  ;;  %v802_v44 = vadd.f32 %v2924_v32, %v661_v47 }
 0x152   : > { %v1073_v18 = vadd.f32 %v2316_v58, %v935_v23 }
 0x153   : > { %v1033_v62 = vpop.f32.mrf.mxu1 }
 0x154   : > { %v2275_v53 = vpop.f32.mrf.mxu0 }
 0x155   : > { %v937_v29 = vadd.f32 %v2275_v53, %v799_v14 }
 0x156   : > { %v905_v61 = vpop.f32.mrf.mxu0 }
 0x157   : > { %v2319_v2 = vpop.f32.mrf.mxu1  ;;  %v936_v37 = vadd.f32 %v905_v61, %v798_v28 }
 0x159   : > { %v1043_v6 = vpop.f32.mrf.mxu1 }
 0x15a   : > { %v2278_v1 = vpop.f32.mrf.mxu0 }
 0x15b   : > { %v939_v40 = vadd.f32 %v2278_v1, %v801_v24 }
 0x15c   : > { %v915_v5 = vpop.f32.mrf.mxu0 }
 0x15d   : > { %v2322_v10 = vpop.f32.mrf.mxu1 }
 0x15e   : > { %v1077_v45 = vadd.f32 %v2322_v10, %v939_v40 }
 0x15f   : > { %v2877_v21 = vpop.f32.mrf.mxu1 }
 0x160   : > { %v2281_v9 = vpop.f32.mrf.mxu0  ;;  %2919 = vst [vmem:[#allocation8_spill] sm:$0xff] %v2877_v21  ;;  %v796_v21 = vadd.f32 %v757_v38, %v655_v60 }
 0x162   : > { %v925_v39 = vpop.f32.mrf.mxu0  ;;  %v934_v11 = vadd.f32 %v895_v49, %v796_v21  ;;  %v803_v49 = vadd.f32 %v2237_v54, %v662_v20 }
 0x163   : > { %v2879_v52 = vpop.f32.mrf.mxu1 }
 0x164   : > { %2920 = vst [vmem:[#allocation9_spill] sm:$0xff] %v2879_v52  ;;  %v1072_v36 = vadd.f32 %v1033_v62, %v934_v11  ;;  %v941_v58 = vadd.f32 %v2281_v9, %v803_v49 }
 0x165   : > { %v2881_v27 = vpop.f32.mrf.mxu1 }
 0x166   : > { %2921 = vst [vmem:[#allocation10_spill] sm:$0xff] %v2881_v27  ;;  %v507_v27 = vadd.f32 %v506_v26, %v401_v17  ;;  %v1075_v26 = vadd.f32 %v2319_v2, %v937_v29 }
 0x167   : > { %v2925_v2 = vld [vmem:[#allocation8_spill] sm:$0xff] }
 0x168   : > { %v659_v12 = vadd.f32 %v636_v42, %v507_v27  ;;  %v1074_v42 = vadd.f32 %v1043_v6, %v936_v37 }
 0x16a   : > { %v800_v17 = vadd.f32 %v777_v48, %v659_v12  ;;  %v940_v48 = vadd.f32 %v925_v39, %v802_v44 }
 0x16b   : > { %v2926_v27 = vld [vmem:[#allocation9_spill] sm:$0xff] }
 0x16c   : > { %v938_v23 = vadd.f32 %v915_v5, %v800_v17 }
 0x16e   : > { %v1076_v6 = vadd.f32 %v2925_v2, %v938_v23 }
 0x176   : > { %v2360_v50 = vpop.f32.mrf.mxu0 }
 0x177   : > { %v1214_v38 = vadd.f32 %v2360_v50, %v1073_v18 }
 0x178   : > { %v1174_v51 = vpop.f32.mrf.mxu0 }
 0x179   : > { %v2404_v33 = vpop.f32.mrf.mxu1  ;;  %v1213_v41 = vadd.f32 %v1174_v51, %v1072_v36 }
 0x17a   : > { %v1352_v53 = vadd.f32 %v2404_v33, %v1214_v38  ;;  %v1079_v33 = vadd.f32 %v2926_v27, %v941_v58 }
 0x17b   : > { %v2363_v22 = vpop.f32.mrf.mxu0  ;;  %v1312_v63 = vpop.f32.mrf.mxu1 }
 0x17c   : > { %v1216_v57 = vadd.f32 %v2363_v22, %v1075_v26  ;;  %v1351_v62 = vadd.f32 %v1312_v63, %v1213_v41  ;;  %v2927_v63 = vld [vmem:[#allocation10_spill] sm:$0xff] }
 0x17d   : > { %v1184_v35 = vpop.f32.mrf.mxu0  ;;  %v2407_v52 = vpop.f32.mrf.mxu1  ;;  %v1078_v3 = vadd.f32 %v2927_v63, %v940_v48 }
 0x17e   : > { %v1215_v61 = vadd.f32 %v1184_v35, %v1074_v42  ;;  %v1354_v5 = vadd.f32 %v2407_v52, %v1216_v57 }
 0x17f   : > { %v1322_v31 = vpop.f32.mrf.mxu1 }
 0x180   : > { %v2366_v0 = vpop.f32.mrf.mxu0  ;;  %v1353_v10 = vadd.f32 %v1322_v31, %v1215_v61 }
 0x181   : > { %v2410_v30 = vpop.f32.mrf.mxu1  ;;  %v1218_v51 = vadd.f32 %v2366_v0, %v1077_v45 }
 0x182   : > { %v1194_v19 = vpop.f32.mrf.mxu0 }
 0x183   : > { %v1332_v54 = vpop.f32.mrf.mxu1  ;;  %v1217_v59 = vadd.f32 %v1194_v19, %v1076_v6  ;;  %v1356_v39 = vadd.f32 %v2410_v30, %v1218_v51 }
 0x184   : > { %v2369_v15 = vpop.f32.mrf.mxu0 }
 0x185   : > { %v2413_v4 = vpop.f32.mrf.mxu1  ;;  %v1220_v8 = vadd.f32 %v2369_v15, %v1079_v33  ;;  %v1355_v16 = vadd.f32 %v1332_v54, %v1217_v59 }
 0x186   : > { %v1204_v43 = vpop.f32.mrf.mxu0 }
 0x187   : > { %v1219_v25 = vadd.f32 %v1204_v43, %v1078_v3  ;;  %v1342_v18 = vpop.f32.mrf.mxu1  ;;  %v1358_v29 = vadd.f32 %v2413_v4, %v1220_v8  ;;  %v1818_v43 = vld [vmem:[%s2912_s4] ss:$0 sm:$0xff] }
 0x189   : > { %v1357_v15 = vadd.f32 %v1342_v18, %v1219_v25 }
 0x198   : > { %v2448_v21 = vpop.f32.mrf.mxu0 }
 0x199   : > { %v1490_v50 = vadd.f32 %v2448_v21, %v1352_v53 }
 0x19a   : > { %v1450_v1 = vpop.f32.mrf.mxu0 }
 0x19b   : > { %v1489_v22 = vadd.f32 %v1450_v1, %v1351_v62  ;;  %v1505_v9 = vadd.f32 %v1817_v46, %v1490_v50 }
 0x19c   : > { %v2451_v56 = vpop.f32.mrf.mxu0 }
 0x19d   : > { %v1504_v35 = vadd.f32 %v1817_v46, %v1489_v22  ;;  %v1492_v60 = vadd.f32 %v2451_v56, %v1354_v5  ;;  %v1513_v11 = vmax.f32 %v1505_v9, 0.0 }
 0x19e   : > { %v1460_v7 = vpop.f32.mrf.mxu0 }
 0x19f   : > { %v1512_v14 = vmax.f32 %v1504_v35, 0.0  ;;  %v1491_v34 = vadd.f32 %v1460_v7, %v1353_v10  ;;  %v1507_v52 = vadd.f32 %v1817_v46, %v1492_v60 }
 0x1a0   : > { %v2454_v0 = vpop.f32.mrf.mxu0 }
 0x1a1   : > { %v1506_v28 = vadd.f32 %v1817_v46, %v1491_v34  ;;  %v1494_v12 = vadd.f32 %v2454_v0, %v1356_v39  ;;  %2490 = vmatprep.mubr.f32.mxu1 %v1512_v14  ;;  %v1515_v20 = vmax.f32 %v1507_v52, 0.0 }
 0x1a2   : > { %v1470_v19 = vpop.f32.mrf.mxu0  ;;  %2491 = vmatmul.mubr.f32.vlgmr.msra.gmra.mxu1 %v1513_v11 }
 0x1a3   : > { %v1514_v55 = vmax.f32 %v1506_v28, 0.0  ;;  %v1493_v13 = vadd.f32 %v1470_v19, %v1355_v16  ;;  %v1509_v31 = vadd.f32 %v1817_v46, %v1494_v12 }
 0x1a4   : > { %v2457_v24 = vpop.f32.mrf.mxu0 }
 0x1a5   : > { %v1508_v36 = vadd.f32 %v1817_v46, %v1493_v13  ;;  %v1496_v37 = vadd.f32 %v2457_v24, %v1358_v29  ;;  %2493 = vmatprep.mubr.f32.mxu1 %v1514_v55  ;;  %v1517_v26 = vmax.f32 %v1509_v31, 0.0 }
 0x1a6   : > { %v1480_v38 = vpop.f32.mrf.mxu0  ;;  %2494 = vmatmul.mubr.f32.gmra.mxu1 %v1515_v20 }
 0x1a7   : > { %v1516_v47 = vmax.f32 %v1508_v36, 0.0  ;;  %v1495_v17 = vadd.f32 %v1480_v38, %v1357_v15  ;;  %v1511_v40 = vadd.f32 %v1817_v46, %v1496_v37 }
 0x1a9   : > { %v1510_v41 = vadd.f32 %v1817_v46, %v1495_v17  ;;  %2496 = vmatprep.mubr.f32.mxu1 %v1516_v47  ;;  %v1519_v30 = vmax.f32 %v1511_v40, 0.0 }
 0x1aa   : > { %2497 = vmatmul.mubr.f32.gmra.mxu1 %v1517_v26 }
 0x1ab   : > { %v1518_v49 = vmax.f32 %v1510_v41, 0.0 }
 0x1ad   : > { %2499 = vmatprep.mubr.f32.mxu1 %v1518_v49 }
 0x1ae   : > { %2500 = vmatmul.mubr.f32.gmra.mxu1 %v1519_v30 }
 0x262   : > { %v2492_v42 = vpop.f32.mrf.mxu1 }
 0x263   : > { %v1615_v23 = vadd.f32 %v2492_v42, %v1818_v43 }
 0x264   : > { %v1609_v53 = vpop.f32.mrf.mxu1 }
 0x265   : > { %1649 = vst [vmem:[%s261_s8 + $0x8] sm:$0xff] %v1615_v23  ;;  %v1610_v57 = vadd.f32 %v1818_v43, %v1609_v53 }
 0x266   : > { %v2495_v32 = vpop.f32.mrf.mxu1 }
 0x267   : > { %1648 = vst [vmem:[%s261_s8] sm:$0xff] %v1610_v57  ;;  %v1625_v44 = vadd.f32 %v2495_v32, %v1818_v43 }
 0x268   : > { %v1619_v58 = vpop.f32.mrf.mxu1 }
 0x269   : > { %1651 = vst [vmem:[%s261_s8 + $0x18] sm:$0xff] %v1625_v44  ;;  %v1620_v21 = vadd.f32 %v1818_v43, %v1619_v58 }
 0x26a   : > { %v2498_v45 = vpop.f32.mrf.mxu1 }
 0x26b   : > { %1650 = vst [vmem:[%s261_s8 + $0x10] sm:$0xff] %v1620_v21  ;;  %v1635_v62 = vadd.f32 %v2498_v45, %v1818_v43 }
 0x26c   : > { %v1629_v61 = vpop.f32.mrf.mxu1 }
 0x26d   : > { %1653 = vst [vmem:[%s261_s8 + $0x28] sm:$0xff] %v1635_v62  ;;  %v1630_v50 = vadd.f32 %v1818_v43, %v1629_v61 }
 0x26e   : > { %v2501_v46 = vpop.f32.mrf.mxu1 }
 0x26f   : > { %1652 = vst [vmem:[%s261_s8 + $0x20] sm:$0xff] %v1630_v50  ;;  %v1645_v48 = vadd.f32 %v2501_v46, %v1818_v43 }
 0x270   : > { %v1639_v54 = vpop.f32.mrf.mxu1 }
 0x271   : > { %1655 = vst [vmem:[%s261_s8 + $0x38] sm:$0xff] %v1645_v48  ;;  %v1640_v1 = vadd.f32 %v1818_v43, %v1639_v54 }
 0x273   : > { %1654 = vst [vmem:[%s261_s8 + $0x30] sm:$0xff] %v1640_v1 }
 0x274 PF: > { %s16_s20 = sadd.s32 1, %s2592_s20   ;;  %s2928_s18 = smov %s2588_s19 }
 0x275   : > { %p13_p2 = scmp.ge.s32.totalorder %s16_s20, 4   ;;  %s2929_s19 = smov %s2931_s22 }
 0x277   :  { %15 = sbr.rel (!%p13_p2) target bundleno = 2 (0x2), region = 86 }
 0x27c   :  { %1686 = vsyncpa [#allocation3], 1 }
 0x27d   :  { %1688 = vsyncpa [#allocation3 + $0x1], 1 }

</bundles_post_ra>
